<compile_context>
chip_gen: v7x
topology: tpu7x:2x2x1
jax: 0.10.0
libtpu: 0.0.40
codegen_flags: <defaults>
</compile_context>

<pallas_src>
import jax
import jax.numpy as jnp
from jax import lax
from jax.experimental import pallas as pl
from jax.experimental.pallas import tpu as pltpu

# ---------------- hyperparameters (small, consistent with the module) -------------
VOCAB_SIZE = 64
VOCAB_PAD  = 128         # lane-padded logits / lm_head width
BLOCK_SIZE = 16          # max context length (position embedding table rows)
D_MODEL    = 32
N_HEAD     = 4
N_LAYER    = 2
HEAD_SIZE  = D_MODEL // N_HEAD
D_FF       = 4 * D_MODEL
LN_EPS     = 1e-5


def _layernorm(x, gamma, beta):
    """Biased-variance LayerNorm (matches torch.nn.LayerNorm). f32 math."""
    mean = jnp.mean(x, axis=-1, keepdims=True)
    var = jnp.mean((x - mean) ** 2, axis=-1, keepdims=True)
    return (x - mean) * lax.rsqrt(var + LN_EPS) * gamma + beta


# ------------------------------ fused Pallas kernel --------------------------------
def _make_kernel(T, Bt):
    """Kernel factory; T (seq len) and Bt (batch rows per grid step) are static."""
    R = Bt * T                                       # rows per activation slab

    def kernel(idx_ref, tok_ref, pos_ref,
               g1_ref, b1_ref, wqkv_ref, wo_ref, bo_ref,
               g2_ref, b2_ref, w1_ref, bf1_ref, w2_ref, bf2_ref,
               gf_ref, bfin_ref, wh_ref, bh_ref,
               out_ref):
        # --- token embedding as an exact bf16 one-hot matmul + positions -----------
        idx = idx_ref[...]                                         # (R, 1) int32
        onehot = (idx == lax.broadcasted_iota(jnp.int32, (R, VOCAB_SIZE), 1)
                  ).astype(jnp.bfloat16)                           # (R, V)
        x = jnp.dot(onehot, tok_ref[...].astype(jnp.bfloat16),
                    preferred_element_type=jnp.float32)            # (R, D) f32
        x = x + pos_ref[...]                                       # pre-tiled (R, D)

        # single 2-D causal mask, hoisted once, broadcast over batch
        row = lax.broadcasted_iota(jnp.int32, (T, T), 0)
        col = lax.broadcasted_iota(jnp.int32, (T, T), 1)
        causal = row >= col                                        # (T, T) bool
        scale = jnp.float32(HEAD_SIZE ** -0.5)

        for l in range(N_LAYER):                                   # static unroll
            # ---------------- causal multi-head self-attention (pre-norm) ----------
            hn = _layernorm(x, g1_ref[l], b1_ref[l]).astype(jnp.bfloat16)   # (R, D)
            # fused QKV projection: one lane-dense (R, D) @ (D, 3D) MXU matmul
            qkv = jnp.dot(hn, wqkv_ref[l],
                          preferred_element_type=jnp.float32)      # (R, 3D) f32
            qkv3 = qkv.reshape(Bt, T, 3 * D_MODEL)                 # per-sequence view

            o_heads = []
            for h in range(N_HEAD):          # tiny (T x T) per-head attention core
                q = qkv3[:, :, h*HEAD_SIZE:(h+1)*HEAD_SIZE].astype(jnp.bfloat16)
                k = qkv3[:, :, D_MODEL + h*HEAD_SIZE:
                               D_MODEL + (h+1)*HEAD_SIZE].astype(jnp.bfloat16)
                v = qkv3[:, :, 2*D_MODEL + h*HEAD_SIZE:
                               2*D_MODEL + (h+1)*HEAD_SIZE].astype(jnp.bfloat16)
                s = jnp.einsum('bqd,bkd->bqk', q, k,
                               preferred_element_type=jnp.float32) * scale  # (Bt,T,T)
                s = jnp.where(causal[None], s, -1e30)
                s = s - jnp.max(s, axis=-1, keepdims=True)
                p = jnp.exp(s)
                p = p * pl.reciprocal(jnp.sum(p, axis=-1, keepdims=True), approx=True)
                o_heads.append(jnp.einsum('bqk,bkd->bqd', p.astype(jnp.bfloat16), v,
                                          preferred_element_type=jnp.float32))
            # concat heads -> single (R, D) @ (D, D) merge matmul (head reduction in MXU)
            o = jnp.concatenate(o_heads, axis=-1).reshape(R, D_MODEL).astype(jnp.bfloat16)
            x = x + jnp.dot(o, wo_ref[l], preferred_element_type=jnp.float32) + bo_ref[l]

            # ---------------- feed-forward (pre-norm) ------------------------------
            hn2 = _layernorm(x, g2_ref[l], b2_ref[l]).astype(jnp.bfloat16)
            f = jnp.dot(hn2, w1_ref[l], preferred_element_type=jnp.float32) + bf1_ref[l]
            f = jnp.maximum(f, 0.0).astype(jnp.bfloat16)      # relu in f32, cast for MXU
            x = x + jnp.dot(f, w2_ref[l], preferred_element_type=jnp.float32) + bf2_ref[l]

        # ---------------- final LayerNorm + lm_head (lane-padded to 128) ------------
        hf = _layernorm(x, gf_ref[...], bfin_ref[...]).astype(jnp.bfloat16)
        out_ref[...] = jnp.dot(hf, wh_ref[...],
                               preferred_element_type=jnp.float32) + bh_ref[...]

    return kernel


# ------------------------------ wrapper ---------------------------------------------
def _replicated(shape):
    """Full-array BlockSpec with a constant index_map (fetched once across the grid)."""
    zeros = (0,) * len(shape)
    return pl.BlockSpec(shape, lambda g, _z=zeros: _z)


_WEIGHT_ORDER = ("g1", "b1", "wqkv", "wo", "bo",
                 "g2", "b2", "w1", "bf1", "w2", "bf2",
                 "gf", "bf", "w_head", "b_head")


def _pick_bt(B, T, rows_target=256):
    """Fold batch rows so each grid step computes on ~rows_target matmul rows."""
    bt = max(1, min(B, rows_target // max(T, 1)))
    while bt > 1 and (B % bt != 0 or (bt * T) % 8 != 0):
        bt -= 1
    if B % bt != 0 or ((bt * T) % 8 != 0 and bt != B):
        bt = B        # fallback: single block covering the whole batch
    return bt


def run_gpt(params, idx, *, rows_target=256):
    B, T = idx.shape
    assert T <= BLOCK_SIZE
    Bt = _pick_bt(B, T, rows_target)
    R = Bt * T

    idx_flat = idx.reshape(B * T, 1).astype(jnp.int32)
    # positional slab, pre-tiled to (Bt*T, D) so the kernel adds it directly
    pos_slab = jnp.tile(params["pos_emb"][:T], (Bt, 1)).astype(jnp.float32)

    weights = [params[k] for k in _WEIGHT_ORDER]
    inputs = [idx_flat, params["tok_emb"], pos_slab] + weights
    in_specs = ([pl.BlockSpec((R, 1), lambda g: (g, 0))]
                + [_replicated(a.shape) for a in inputs[1:]])

    out = pl.pallas_call(
        _make_kernel(T, Bt),
        grid=(B // Bt,),
        in_specs=in_specs,
        out_specs=pl.BlockSpec((R, VOCAB_PAD), lambda g: (g, 0)),
        out_shape=jax.ShapeDtypeStruct((B * T, VOCAB_PAD), jnp.float32),
        compiler_params=pltpu.CompilerParams(dimension_semantics=("parallel",)),
    )(*inputs)

    # slice lane padding back to the real vocab and restore (B, T, V)
    return out[:, :VOCAB_SIZE].reshape(B, T, VOCAB_SIZE)


# ------------------------------ parameter init --------------------------------------
def init_params(key):
    keys = iter(jax.random.split(key, 8))

    def nrm(shape, dtype=jnp.float32):
        return (0.02 * jax.random.normal(next(keys), shape, jnp.float32)).astype(dtype)

    L = N_LAYER
    bf16 = jnp.bfloat16

    # lm_head lane-padded to 128 (zero columns beyond the vocab)
    w_head = jnp.zeros((D_MODEL, VOCAB_PAD), jnp.float32)
    w_head = w_head.at[:, :VOCAB_SIZE].set(
        0.02 * jax.random.normal(next(keys), (D_MODEL, VOCAB_SIZE), jnp.float32))

    params = {
        "tok_emb": nrm((VOCAB_SIZE, D_MODEL)),
        "pos_emb": nrm((BLOCK_SIZE, D_MODEL)),
        # per-layer params stacked along a leading layer axis; wide axis last
        "g1": jnp.ones((L, 1, D_MODEL), jnp.float32),
        "b1": jnp.zeros((L, 1, D_MODEL), jnp.float32),
        "wqkv": nrm((L, D_MODEL, 3 * D_MODEL), bf16),        # fused [Wq | Wk | Wv]
        "wo": nrm((L, D_MODEL, D_MODEL), bf16),               # (H*hs, D) head-merge
        "bo": jnp.zeros((L, 1, D_MODEL), jnp.float32),
        "g2": jnp.ones((L, 1, D_MODEL), jnp.float32),
        "b2": jnp.zeros((L, 1, D_MODEL), jnp.float32),
        "w1": nrm((L, D_MODEL, D_FF), bf16),
        "bf1": jnp.zeros((L, 1, D_FF), jnp.float32),
        "w2": nrm((L, D_FF, D_MODEL), bf16),
        "bf2": jnp.zeros((L, 1, D_MODEL), jnp.float32),
        # final LN + head
        "gf": jnp.ones((1, D_MODEL), jnp.float32),
        "bf": jnp.zeros((1, D_MODEL), jnp.float32),
        "w_head": w_head.astype(bf16),
        "b_head": jnp.zeros((1, VOCAB_PAD), jnp.float32),
    }
    return params


# ------------------------------ full forward pass ------------------------------------
def transformer_forward(params, idx, targets=None):
    B, T = idx.shape
    logits = run_gpt(params, idx)                       # single fused Pallas call (B,T,V)

    if targets is None:
        return logits, None

    # glue: cross-entropy loss (mean over B*T rows) in plain JAX, matches torch forward
    V = logits.shape[-1]
    flat_logits = logits.reshape(B * T, V)
    flat_targets = targets.reshape(B * T)
    lse = jax.nn.logsumexp(flat_logits, axis=-1)
    tgt_logit = jnp.take_along_axis(flat_logits, flat_targets[:, None], axis=-1)[:, 0]
    loss = jnp.mean(lse - tgt_logit)
    return flat_logits, loss


# ------------------------------ main --------------------------------------------------
if __name__ == "__main__":
    key = jax.random.PRNGKey(0)
    k_params, k_idx, k_tgt = jax.random.split(key, 3)

    params = init_params(k_params)

    B, T = 2, 8
    idx = jax.random.randint(k_idx, (B, T), 0, VOCAB_SIZE, dtype=jnp.int32)
    targets = jax.random.randint(k_tgt, (B, T), 0, VOCAB_SIZE, dtype=jnp.int32)

    logits, loss = transformer_forward(params, idx, targets)
    jax.block_until_ready(logits)
    jax.block_until_ready(loss)

    assert logits.shape == (B * T, VOCAB_SIZE)
    assert jnp.isfinite(loss)

    logits_only, no_loss = transformer_forward(params, idx, None)
    jax.block_until_ready(logits_only)
    assert logits_only.shape == (B, T, VOCAB_SIZE)
    assert no_loss is None

    print("KERNEL_OK")
</pallas_src>

<mosaic_0001>
module attributes {stable_mosaic.version = 11 : i64} {
  func.func @kernel(%arg0: i32, %arg1: memref<16x1xi32, #tpu.memory_space<vmem>>, %arg2: memref<64x32xf32, #tpu.memory_space<vmem>>, %arg3: memref<16x32xf32, #tpu.memory_space<vmem>>, %arg4: memref<2x1x32xf32, #tpu.memory_space<vmem>>, %arg5: memref<2x1x32xf32, #tpu.memory_space<vmem>>, %arg6: memref<2x32x96xbf16, #tpu.memory_space<vmem>>, %arg7: memref<2x32x32xbf16, #tpu.memory_space<vmem>>, %arg8: memref<2x1x32xf32, #tpu.memory_space<vmem>>, %arg9: memref<2x1x32xf32, #tpu.memory_space<vmem>>, %arg10: memref<2x1x32xf32, #tpu.memory_space<vmem>>, %arg11: memref<2x32x128xbf16, #tpu.memory_space<vmem>>, %arg12: memref<2x1x128xf32, #tpu.memory_space<vmem>>, %arg13: memref<2x128x32xbf16, #tpu.memory_space<vmem>>, %arg14: memref<2x1x32xf32, #tpu.memory_space<vmem>>, %arg15: memref<1x32xf32, #tpu.memory_space<vmem>>, %arg16: memref<1x32xf32, #tpu.memory_space<vmem>>, %arg17: memref<32x128xbf16, #tpu.memory_space<vmem>>, %arg18: memref<1x128xf32, #tpu.memory_space<vmem>>, %arg19: memref<16x128xf32, #tpu.memory_space<vmem>>) attributes {dimension_semantics = [#tpu.dimension_semantics<parallel>], iteration_bounds = array<i64: 1>, scalar_prefetch = 0 : i64, scratch_operands = 0 : i64, tpu.core_type = #tpu.core_type<tc>, window_params = [{transform_indices = @transform_0, window_bounds = array<i64: 16, 1>}, {pipeline_mode = #tpu.pipeline_mode<synchronous>, transform_indices = @transform_1, window_bounds = array<i64: 64, 32>}, {pipeline_mode = #tpu.pipeline_mode<synchronous>, transform_indices = @transform_2, window_bounds = array<i64: 16, 32>}, {pipeline_mode = #tpu.pipeline_mode<synchronous>, transform_indices = @transform_3, window_bounds = array<i64: 2, 1, 32>}, {pipeline_mode = #tpu.pipeline_mode<synchronous>, transform_indices = @transform_4, window_bounds = array<i64: 2, 1, 32>}, {pipeline_mode = #tpu.pipeline_mode<synchronous>, transform_indices = @transform_5, window_bounds = array<i64: 2, 32, 96>}, {pipeline_mode = #tpu.pipeline_mode<synchronous>, transform_indices = @transform_6, window_bounds = array<i64: 2, 32, 32>}, {pipeline_mode = #tpu.pipeline_mode<synchronous>, transform_indices = @transform_7, window_bounds = array<i64: 2, 1, 32>}, {pipeline_mode = #tpu.pipeline_mode<synchronous>, transform_indices = @transform_8, window_bounds = array<i64: 2, 1, 32>}, {pipeline_mode = #tpu.pipeline_mode<synchronous>, transform_indices = @transform_9, window_bounds = array<i64: 2, 1, 32>}, {pipeline_mode = #tpu.pipeline_mode<synchronous>, transform_indices = @transform_10, window_bounds = array<i64: 2, 32, 128>}, {pipeline_mode = #tpu.pipeline_mode<synchronous>, transform_indices = @transform_11, window_bounds = array<i64: 2, 1, 128>}, {pipeline_mode = #tpu.pipeline_mode<synchronous>, transform_indices = @transform_12, window_bounds = array<i64: 2, 128, 32>}, {pipeline_mode = #tpu.pipeline_mode<synchronous>, transform_indices = @transform_13, window_bounds = array<i64: 2, 1, 32>}, {pipeline_mode = #tpu.pipeline_mode<synchronous>, transform_indices = @transform_14, window_bounds = array<i64: 1, 32>}, {pipeline_mode = #tpu.pipeline_mode<synchronous>, transform_indices = @transform_15, window_bounds = array<i64: 1, 32>}, {pipeline_mode = #tpu.pipeline_mode<synchronous>, transform_indices = @transform_16, window_bounds = array<i64: 32, 128>}, {pipeline_mode = #tpu.pipeline_mode<synchronous>, transform_indices = @transform_17, window_bounds = array<i64: 1, 128>}, {transform_indices = @transform_18, window_bounds = array<i64: 16, 128>}]} {
    %c0 = arith.constant 0 : index
    %c0_0 = arith.constant 0 : index
    %0 = vector.load %arg1[%c0, %c0_0] : memref<16x1xi32, #tpu.memory_space<vmem>>, vector<16x1xi32>
    %1 = tpu.iota {dimensions = array<i32: 1>} : vector<16x64xi32>
    %2 = vector.broadcast %0 : vector<16x1xi32> to vector<16x64xi32>
    %3 = arith.cmpi eq, %2, %1 : vector<16x64xi32>
    %4 = arith.extui %3 : vector<16x64xi1> to vector<16x64xi32>
    %5 = arith.sitofp %4 : vector<16x64xi32> to vector<16x64xf32>
    %6 = arith.truncf %5 : vector<16x64xf32> to vector<16x64xbf16>
    %c0_1 = arith.constant 0 : index
    %c0_2 = arith.constant 0 : index
    %7 = vector.load %arg2[%c0_1, %c0_2] : memref<64x32xf32, #tpu.memory_space<vmem>>, vector<64x32xf32>
    %8 = arith.truncf %7 : vector<64x32xf32> to vector<64x32xbf16>
    %cst = arith.constant dense<0.000000e+00> : vector<16x32xf32>
    %9 = tpu.matmul %6, %8, %cst {dimension_numbers = #tpu.dot_dimension_numbers<[1], [0], [0], [1], [0, 0, 1, 1], [], []>} : vector<16x64xbf16>, vector<64x32xbf16>, vector<16x32xf32> -> vector<16x32xf32>
    %c0_3 = arith.constant 0 : index
    %c0_4 = arith.constant 0 : index
    %10 = vector.load %arg3[%c0_3, %c0_4] : memref<16x32xf32, #tpu.memory_space<vmem>>, vector<16x32xf32>
    %11 = arith.addf %9, %10 : vector<16x32xf32>
    %12 = tpu.iota {dimensions = array<i32: 0>} : vector<8x8xi32>
    %13 = tpu.iota {dimensions = array<i32: 1>} : vector<8x8xi32>
    %14 = arith.cmpi sge, %12, %13 : vector<8x8xi32>
    %c0_5 = arith.constant 0 : index
    %c0_6 = arith.constant 0 : index
    %c0_7 = arith.constant 0 : index
    %15 = vector.load %arg4[%c0_5, %c0_6, %c0_7] : memref<2x1x32xf32, #tpu.memory_space<vmem>>, vector<1x1x32xf32>
    %16 = vector.shape_cast %15 : vector<1x1x32xf32> to vector<1x32xf32>
    %c0_8 = arith.constant 0 : index
    %c0_9 = arith.constant 0 : index
    %c0_10 = arith.constant 0 : index
    %17 = vector.load %arg5[%c0_8, %c0_9, %c0_10] : memref<2x1x32xf32, #tpu.memory_space<vmem>>, vector<1x1x32xf32>
    %18 = vector.shape_cast %17 : vector<1x1x32xf32> to vector<1x32xf32>
    %cst_11 = arith.constant dense<0.000000e+00> : vector<16xf32>
    %19 = vector.multi_reduction <add>, %11, %cst_11 [1] : vector<16x32xf32> to vector<16xf32>
    %20 = vector.shape_cast %19 : vector<16xf32> to vector<16x1xf32>
    %cst_12 = arith.constant 3.200000e+01 : f32
    %21 = vector.broadcast %cst_12 : f32 to vector<16x1xf32>
    %22 = arith.divf %20, %21 : vector<16x1xf32>
    %23 = vector.broadcast %22 : vector<16x1xf32> to vector<16x32xf32>
    %24 = arith.subf %11, %23 : vector<16x32xf32>
    %25 = arith.mulf %24, %24 : vector<16x32xf32>
    %cst_13 = arith.constant dense<0.000000e+00> : vector<16xf32>
    %26 = vector.multi_reduction <add>, %25, %cst_13 [1] : vector<16x32xf32> to vector<16xf32>
    %27 = vector.shape_cast %26 : vector<16xf32> to vector<16x1xf32>
    %cst_14 = arith.constant 3.200000e+01 : f32
    %28 = vector.broadcast %cst_14 : f32 to vector<16x1xf32>
    %29 = arith.divf %27, %28 : vector<16x1xf32>
    %30 = vector.broadcast %22 : vector<16x1xf32> to vector<16x32xf32>
    %31 = arith.subf %11, %30 : vector<16x32xf32>
    %cst_15 = arith.constant 9.99999974E-6 : f32
    %32 = vector.broadcast %cst_15 : f32 to vector<16x1xf32>
    %33 = arith.addf %29, %32 : vector<16x1xf32>
    %34 = math.rsqrt %33 : vector<16x1xf32>
    %35 = vector.broadcast %34 : vector<16x1xf32> to vector<16x32xf32>
    %36 = arith.mulf %31, %35 : vector<16x32xf32>
    %37 = vector.broadcast %16 : vector<1x32xf32> to vector<16x32xf32>
    %38 = arith.mulf %36, %37 : vector<16x32xf32>
    %39 = vector.broadcast %18 : vector<1x32xf32> to vector<16x32xf32>
    %40 = arith.addf %38, %39 : vector<16x32xf32>
    %41 = arith.truncf %40 : vector<16x32xf32> to vector<16x32xbf16>
    %c0_16 = arith.constant 0 : index
    %c0_17 = arith.constant 0 : index
    %c0_18 = arith.constant 0 : index
    %42 = vector.load %arg6[%c0_16, %c0_17, %c0_18] : memref<2x32x96xbf16, #tpu.memory_space<vmem>>, vector<1x32x96xbf16>
    %43 = vector.shape_cast %42 : vector<1x32x96xbf16> to vector<32x96xbf16>
    %cst_19 = arith.constant dense<0.000000e+00> : vector<16x96xf32>
    %44 = tpu.matmul %41, %43, %cst_19 {dimension_numbers = #tpu.dot_dimension_numbers<[1], [0], [0], [1], [0, 0, 1, 1], [], []>} : vector<16x32xbf16>, vector<32x96xbf16>, vector<16x96xf32> -> vector<16x96xf32>
    %45 = vector.shape_cast %44 : vector<16x96xf32> to vector<2x8x96xf32>
    %46 = vector.extract_strided_slice %45 {offsets = [0, 0, 0], sizes = [2, 8, 8], strides = [1, 1, 1]} : vector<2x8x96xf32> to vector<2x8x8xf32>
    %47 = arith.truncf %46 : vector<2x8x8xf32> to vector<2x8x8xbf16>
    %48 = vector.extract_strided_slice %45 {offsets = [0, 0, 32], sizes = [2, 8, 8], strides = [1, 1, 1]} : vector<2x8x96xf32> to vector<2x8x8xf32>
    %49 = arith.truncf %48 : vector<2x8x8xf32> to vector<2x8x8xbf16>
    %50 = vector.extract_strided_slice %45 {offsets = [0, 0, 64], sizes = [2, 8, 8], strides = [1, 1, 1]} : vector<2x8x96xf32> to vector<2x8x8xf32>
    %51 = arith.truncf %50 : vector<2x8x8xf32> to vector<2x8x8xbf16>
    "tpu.trace_start"() <{level = 10 : i32, message = "bqd,bkd->bqk"}> : () -> ()
    %cst_20 = arith.constant dense<0.000000e+00> : vector<2x8x8xf32>
    %52 = tpu.matmul %47, %49, %cst_20 {dimension_numbers = #tpu.dot_dimension_numbers<[2], [2], [1], [1], [0, 0, 0, 1, 1, 1], [0], [0]>} : vector<2x8x8xbf16>, vector<2x8x8xbf16>, vector<2x8x8xf32> -> vector<2x8x8xf32>
    "tpu.trace_stop"() : () -> ()
    %cst_21 = arith.constant 0.353553385 : f32
    %53 = vector.broadcast %cst_21 : f32 to vector<2x8x8xf32>
    %54 = arith.mulf %52, %53 : vector<2x8x8xf32>
    %55 = vector.shape_cast %14 : vector<8x8xi1> to vector<1x8x8xi1>
    %cst_22 = arith.constant -1.000000e+30 : f32
    %56 = vector.shape_cast %55 : vector<1x8x8xi1> to vector<1x8x8xi1>
    %57 = vector.broadcast %56 : vector<1x8x8xi1> to vector<2x8x8xi1>
    %58 = vector.broadcast %cst_22 : f32 to vector<2x8x8xf32>
    %59 = arith.select %57, %54, %58 : vector<2x8x8xi1>, vector<2x8x8xf32>
    %cst_23 = arith.constant dense<0xFF800000> : vector<2x8xf32>
    %60 = vector.multi_reduction <maximumf>, %59, %cst_23 [2] : vector<2x8x8xf32> to vector<2x8xf32>
    %61 = vector.shape_cast %60 : vector<2x8xf32> to vector<2x8x1xf32>
    %62 = vector.broadcast %61 : vector<2x8x1xf32> to vector<2x8x8xf32>
    %63 = arith.subf %59, %62 : vector<2x8x8xf32>
    %64 = math.exp %63 : vector<2x8x8xf32>
    %cst_24 = arith.constant dense<0.000000e+00> : vector<2x8xf32>
    %65 = vector.multi_reduction <add>, %64, %cst_24 [2] : vector<2x8x8xf32> to vector<2x8xf32>
    %66 = vector.shape_cast %65 : vector<2x8xf32> to vector<2x8x1xf32>
    %67 = tpu.reciprocal %66 {approx = true} : vector<2x8x1xf32> -> vector<2x8x1xf32>
    %68 = vector.broadcast %67 : vector<2x8x1xf32> to vector<2x8x8xf32>
    %69 = arith.mulf %64, %68 : vector<2x8x8xf32>
    %70 = arith.truncf %69 : vector<2x8x8xf32> to vector<2x8x8xbf16>
    "tpu.trace_start"() <{level = 10 : i32, message = "bqk,bkd->bqd"}> : () -> ()
    %cst_25 = arith.constant dense<0.000000e+00> : vector<2x8x8xf32>
    %71 = tpu.matmul %70, %51, %cst_25 {dimension_numbers = #tpu.dot_dimension_numbers<[2], [1], [1], [2], [0, 0, 0, 1, 1, 2], [0], [0]>} : vector<2x8x8xbf16>, vector<2x8x8xbf16>, vector<2x8x8xf32> -> vector<2x8x8xf32>
    "tpu.trace_stop"() : () -> ()
    %72 = vector.extract_strided_slice %45 {offsets = [0, 0, 8], sizes = [2, 8, 8], strides = [1, 1, 1]} : vector<2x8x96xf32> to vector<2x8x8xf32>
    %73 = arith.truncf %72 : vector<2x8x8xf32> to vector<2x8x8xbf16>
    %74 = vector.extract_strided_slice %45 {offsets = [0, 0, 40], sizes = [2, 8, 8], strides = [1, 1, 1]} : vector<2x8x96xf32> to vector<2x8x8xf32>
    %75 = arith.truncf %74 : vector<2x8x8xf32> to vector<2x8x8xbf16>
    %76 = vector.extract_strided_slice %45 {offsets = [0, 0, 72], sizes = [2, 8, 8], strides = [1, 1, 1]} : vector<2x8x96xf32> to vector<2x8x8xf32>
    %77 = arith.truncf %76 : vector<2x8x8xf32> to vector<2x8x8xbf16>
    "tpu.trace_start"() <{level = 10 : i32, message = "bqd,bkd->bqk"}> : () -> ()
    %cst_26 = arith.constant dense<0.000000e+00> : vector<2x8x8xf32>
    %78 = tpu.matmul %73, %75, %cst_26 {dimension_numbers = #tpu.dot_dimension_numbers<[2], [2], [1], [1], [0, 0, 0, 1, 1, 1], [0], [0]>} : vector<2x8x8xbf16>, vector<2x8x8xbf16>, vector<2x8x8xf32> -> vector<2x8x8xf32>
    "tpu.trace_stop"() : () -> ()
    %cst_27 = arith.constant 0.353553385 : f32
    %79 = vector.broadcast %cst_27 : f32 to vector<2x8x8xf32>
    %80 = arith.mulf %78, %79 : vector<2x8x8xf32>
    %81 = vector.shape_cast %14 : vector<8x8xi1> to vector<1x8x8xi1>
    %cst_28 = arith.constant -1.000000e+30 : f32
    %82 = vector.shape_cast %81 : vector<1x8x8xi1> to vector<1x8x8xi1>
    %83 = vector.broadcast %82 : vector<1x8x8xi1> to vector<2x8x8xi1>
    %84 = vector.broadcast %cst_28 : f32 to vector<2x8x8xf32>
    %85 = arith.select %83, %80, %84 : vector<2x8x8xi1>, vector<2x8x8xf32>
    %cst_29 = arith.constant dense<0xFF800000> : vector<2x8xf32>
    %86 = vector.multi_reduction <maximumf>, %85, %cst_29 [2] : vector<2x8x8xf32> to vector<2x8xf32>
    %87 = vector.shape_cast %86 : vector<2x8xf32> to vector<2x8x1xf32>
    %88 = vector.broadcast %87 : vector<2x8x1xf32> to vector<2x8x8xf32>
    %89 = arith.subf %85, %88 : vector<2x8x8xf32>
    %90 = math.exp %89 : vector<2x8x8xf32>
    %cst_30 = arith.constant dense<0.000000e+00> : vector<2x8xf32>
    %91 = vector.multi_reduction <add>, %90, %cst_30 [2] : vector<2x8x8xf32> to vector<2x8xf32>
    %92 = vector.shape_cast %91 : vector<2x8xf32> to vector<2x8x1xf32>
    %93 = tpu.reciprocal %92 {approx = true} : vector<2x8x1xf32> -> vector<2x8x1xf32>
    %94 = vector.broadcast %93 : vector<2x8x1xf32> to vector<2x8x8xf32>
    %95 = arith.mulf %90, %94 : vector<2x8x8xf32>
    %96 = arith.truncf %95 : vector<2x8x8xf32> to vector<2x8x8xbf16>
    "tpu.trace_start"() <{level = 10 : i32, message = "bqk,bkd->bqd"}> : () -> ()
    %cst_31 = arith.constant dense<0.000000e+00> : vector<2x8x8xf32>
    %97 = tpu.matmul %96, %77, %cst_31 {dimension_numbers = #tpu.dot_dimension_numbers<[2], [1], [1], [2], [0, 0, 0, 1, 1, 2], [0], [0]>} : vector<2x8x8xbf16>, vector<2x8x8xbf16>, vector<2x8x8xf32> -> vector<2x8x8xf32>
    "tpu.trace_stop"() : () -> ()
    %98 = vector.extract_strided_slice %45 {offsets = [0, 0, 16], sizes = [2, 8, 8], strides = [1, 1, 1]} : vector<2x8x96xf32> to vector<2x8x8xf32>
    %99 = arith.truncf %98 : vector<2x8x8xf32> to vector<2x8x8xbf16>
    %100 = vector.extract_strided_slice %45 {offsets = [0, 0, 48], sizes = [2, 8, 8], strides = [1, 1, 1]} : vector<2x8x96xf32> to vector<2x8x8xf32>
    %101 = arith.truncf %100 : vector<2x8x8xf32> to vector<2x8x8xbf16>
    %102 = vector.extract_strided_slice %45 {offsets = [0, 0, 80], sizes = [2, 8, 8], strides = [1, 1, 1]} : vector<2x8x96xf32> to vector<2x8x8xf32>
    %103 = arith.truncf %102 : vector<2x8x8xf32> to vector<2x8x8xbf16>
    "tpu.trace_start"() <{level = 10 : i32, message = "bqd,bkd->bqk"}> : () -> ()
    %cst_32 = arith.constant dense<0.000000e+00> : vector<2x8x8xf32>
    %104 = tpu.matmul %99, %101, %cst_32 {dimension_numbers = #tpu.dot_dimension_numbers<[2], [2], [1], [1], [0, 0, 0, 1, 1, 1], [0], [0]>} : vector<2x8x8xbf16>, vector<2x8x8xbf16>, vector<2x8x8xf32> -> vector<2x8x8xf32>
    "tpu.trace_stop"() : () -> ()
    %cst_33 = arith.constant 0.353553385 : f32
    %105 = vector.broadcast %cst_33 : f32 to vector<2x8x8xf32>
    %106 = arith.mulf %104, %105 : vector<2x8x8xf32>
    %107 = vector.shape_cast %14 : vector<8x8xi1> to vector<1x8x8xi1>
    %cst_34 = arith.constant -1.000000e+30 : f32
    %108 = vector.shape_cast %107 : vector<1x8x8xi1> to vector<1x8x8xi1>
    %109 = vector.broadcast %108 : vector<1x8x8xi1> to vector<2x8x8xi1>
    %110 = vector.broadcast %cst_34 : f32 to vector<2x8x8xf32>
    %111 = arith.select %109, %106, %110 : vector<2x8x8xi1>, vector<2x8x8xf32>
    %cst_35 = arith.constant dense<0xFF800000> : vector<2x8xf32>
    %112 = vector.multi_reduction <maximumf>, %111, %cst_35 [2] : vector<2x8x8xf32> to vector<2x8xf32>
    %113 = vector.shape_cast %112 : vector<2x8xf32> to vector<2x8x1xf32>
    %114 = vector.broadcast %113 : vector<2x8x1xf32> to vector<2x8x8xf32>
    %115 = arith.subf %111, %114 : vector<2x8x8xf32>
    %116 = math.exp %115 : vector<2x8x8xf32>
    %cst_36 = arith.constant dense<0.000000e+00> : vector<2x8xf32>
    %117 = vector.multi_reduction <add>, %116, %cst_36 [2] : vector<2x8x8xf32> to vector<2x8xf32>
    %118 = vector.shape_cast %117 : vector<2x8xf32> to vector<2x8x1xf32>
    %119 = tpu.reciprocal %118 {approx = true} : vector<2x8x1xf32> -> vector<2x8x1xf32>
    %120 = vector.broadcast %119 : vector<2x8x1xf32> to vector<2x8x8xf32>
    %121 = arith.mulf %116, %120 : vector<2x8x8xf32>
    %122 = arith.truncf %121 : vector<2x8x8xf32> to vector<2x8x8xbf16>
    "tpu.trace_start"() <{level = 10 : i32, message = "bqk,bkd->bqd"}> : () -> ()
    %cst_37 = arith.constant dense<0.000000e+00> : vector<2x8x8xf32>
    %123 = tpu.matmul %122, %103, %cst_37 {dimension_numbers = #tpu.dot_dimension_numbers<[2], [1], [1], [2], [0, 0, 0, 1, 1, 2], [0], [0]>} : vector<2x8x8xbf16>, vector<2x8x8xbf16>, vector<2x8x8xf32> -> vector<2x8x8xf32>
    "tpu.trace_stop"() : () -> ()
    %124 = vector.extract_strided_slice %45 {offsets = [0, 0, 24], sizes = [2, 8, 8], strides = [1, 1, 1]} : vector<2x8x96xf32> to vector<2x8x8xf32>
    %125 = arith.truncf %124 : vector<2x8x8xf32> to vector<2x8x8xbf16>
    %126 = vector.extract_strided_slice %45 {offsets = [0, 0, 56], sizes = [2, 8, 8], strides = [1, 1, 1]} : vector<2x8x96xf32> to vector<2x8x8xf32>
    %127 = arith.truncf %126 : vector<2x8x8xf32> to vector<2x8x8xbf16>
    %128 = vector.extract_strided_slice %45 {offsets = [0, 0, 88], sizes = [2, 8, 8], strides = [1, 1, 1]} : vector<2x8x96xf32> to vector<2x8x8xf32>
    %129 = arith.truncf %128 : vector<2x8x8xf32> to vector<2x8x8xbf16>
    "tpu.trace_start"() <{level = 10 : i32, message = "bqd,bkd->bqk"}> : () -> ()
    %cst_38 = arith.constant dense<0.000000e+00> : vector<2x8x8xf32>
    %130 = tpu.matmul %125, %127, %cst_38 {dimension_numbers = #tpu.dot_dimension_numbers<[2], [2], [1], [1], [0, 0, 0, 1, 1, 1], [0], [0]>} : vector<2x8x8xbf16>, vector<2x8x8xbf16>, vector<2x8x8xf32> -> vector<2x8x8xf32>
    "tpu.trace_stop"() : () -> ()
    %cst_39 = arith.constant 0.353553385 : f32
    %131 = vector.broadcast %cst_39 : f32 to vector<2x8x8xf32>
    %132 = arith.mulf %130, %131 : vector<2x8x8xf32>
    %133 = vector.shape_cast %14 : vector<8x8xi1> to vector<1x8x8xi1>
    %cst_40 = arith.constant -1.000000e+30 : f32
    %134 = vector.shape_cast %133 : vector<1x8x8xi1> to vector<1x8x8xi1>
    %135 = vector.broadcast %134 : vector<1x8x8xi1> to vector<2x8x8xi1>
    %136 = vector.broadcast %cst_40 : f32 to vector<2x8x8xf32>
    %137 = arith.select %135, %132, %136 : vector<2x8x8xi1>, vector<2x8x8xf32>
    %cst_41 = arith.constant dense<0xFF800000> : vector<2x8xf32>
    %138 = vector.multi_reduction <maximumf>, %137, %cst_41 [2] : vector<2x8x8xf32> to vector<2x8xf32>
    %139 = vector.shape_cast %138 : vector<2x8xf32> to vector<2x8x1xf32>
    %140 = vector.broadcast %139 : vector<2x8x1xf32> to vector<2x8x8xf32>
    %141 = arith.subf %137, %140 : vector<2x8x8xf32>
    %142 = math.exp %141 : vector<2x8x8xf32>
    %cst_42 = arith.constant dense<0.000000e+00> : vector<2x8xf32>
    %143 = vector.multi_reduction <add>, %142, %cst_42 [2] : vector<2x8x8xf32> to vector<2x8xf32>
    %144 = vector.shape_cast %143 : vector<2x8xf32> to vector<2x8x1xf32>
    %145 = tpu.reciprocal %144 {approx = true} : vector<2x8x1xf32> -> vector<2x8x1xf32>
    %146 = vector.broadcast %145 : vector<2x8x1xf32> to vector<2x8x8xf32>
    %147 = arith.mulf %142, %146 : vector<2x8x8xf32>
    %148 = arith.truncf %147 : vector<2x8x8xf32> to vector<2x8x8xbf16>
    "tpu.trace_start"() <{level = 10 : i32, message = "bqk,bkd->bqd"}> : () -> ()
    %cst_43 = arith.constant dense<0.000000e+00> : vector<2x8x8xf32>
    %149 = tpu.matmul %148, %129, %cst_43 {dimension_numbers = #tpu.dot_dimension_numbers<[2], [1], [1], [2], [0, 0, 0, 1, 1, 2], [0], [0]>} : vector<2x8x8xbf16>, vector<2x8x8xbf16>, vector<2x8x8xf32> -> vector<2x8x8xf32>
    "tpu.trace_stop"() : () -> ()
    %150 = tpu.concatenate %71, %97, %123, %149 in 2 : vector<2x8x8xf32>, vector<2x8x8xf32>, vector<2x8x8xf32>, vector<2x8x8xf32> -> vector<2x8x32xf32>
    %151 = vector.shape_cast %150 : vector<2x8x32xf32> to vector<16x32xf32>
    %152 = arith.truncf %151 : vector<16x32xf32> to vector<16x32xbf16>
    %c0_44 = arith.constant 0 : index
    %c0_45 = arith.constant 0 : index
    %c0_46 = arith.constant 0 : index
    %153 = vector.load %arg7[%c0_44, %c0_45, %c0_46] : memref<2x32x32xbf16, #tpu.memory_space<vmem>>, vector<1x32x32xbf16>
    %154 = vector.shape_cast %153 : vector<1x32x32xbf16> to vector<32x32xbf16>
    %cst_47 = arith.constant dense<0.000000e+00> : vector<16x32xf32>
    %155 = tpu.matmul %152, %154, %cst_47 {dimension_numbers = #tpu.dot_dimension_numbers<[1], [0], [0], [1], [0, 0, 1, 1], [], []>} : vector<16x32xbf16>, vector<32x32xbf16>, vector<16x32xf32> -> vector<16x32xf32>
    %156 = arith.addf %11, %155 : vector<16x32xf32>
    %c0_48 = arith.constant 0 : index
    %c0_49 = arith.constant 0 : index
    %c0_50 = arith.constant 0 : index
    %157 = vector.load %arg8[%c0_48, %c0_49, %c0_50] : memref<2x1x32xf32, #tpu.memory_space<vmem>>, vector<1x1x32xf32>
    %158 = vector.shape_cast %157 : vector<1x1x32xf32> to vector<1x32xf32>
    %159 = vector.broadcast %158 : vector<1x32xf32> to vector<16x32xf32>
    %160 = arith.addf %156, %159 : vector<16x32xf32>
    %c0_51 = arith.constant 0 : index
    %c0_52 = arith.constant 0 : index
    %c0_53 = arith.constant 0 : index
    %161 = vector.load %arg9[%c0_51, %c0_52, %c0_53] : memref<2x1x32xf32, #tpu.memory_space<vmem>>, vector<1x1x32xf32>
    %162 = vector.shape_cast %161 : vector<1x1x32xf32> to vector<1x32xf32>
    %c0_54 = arith.constant 0 : index
    %c0_55 = arith.constant 0 : index
    %c0_56 = arith.constant 0 : index
    %163 = vector.load %arg10[%c0_54, %c0_55, %c0_56] : memref<2x1x32xf32, #tpu.memory_space<vmem>>, vector<1x1x32xf32>
    %164 = vector.shape_cast %163 : vector<1x1x32xf32> to vector<1x32xf32>
    %cst_57 = arith.constant dense<0.000000e+00> : vector<16xf32>
    %165 = vector.multi_reduction <add>, %160, %cst_57 [1] : vector<16x32xf32> to vector<16xf32>
    %166 = vector.shape_cast %165 : vector<16xf32> to vector<16x1xf32>
    %cst_58 = arith.constant 3.200000e+01 : f32
    %167 = vector.broadcast %cst_58 : f32 to vector<16x1xf32>
    %168 = arith.divf %166, %167 : vector<16x1xf32>
    %169 = vector.broadcast %168 : vector<16x1xf32> to vector<16x32xf32>
    %170 = arith.subf %160, %169 : vector<16x32xf32>
    %171 = arith.mulf %170, %170 : vector<16x32xf32>
    %cst_59 = arith.constant dense<0.000000e+00> : vector<16xf32>
    %172 = vector.multi_reduction <add>, %171, %cst_59 [1] : vector<16x32xf32> to vector<16xf32>
    %173 = vector.shape_cast %172 : vector<16xf32> to vector<16x1xf32>
    %cst_60 = arith.constant 3.200000e+01 : f32
    %174 = vector.broadcast %cst_60 : f32 to vector<16x1xf32>
    %175 = arith.divf %173, %174 : vector<16x1xf32>
    %176 = vector.broadcast %168 : vector<16x1xf32> to vector<16x32xf32>
    %177 = arith.subf %160, %176 : vector<16x32xf32>
    %cst_61 = arith.constant 9.99999974E-6 : f32
    %178 = vector.broadcast %cst_61 : f32 to vector<16x1xf32>
    %179 = arith.addf %175, %178 : vector<16x1xf32>
    %180 = math.rsqrt %179 : vector<16x1xf32>
    %181 = vector.broadcast %180 : vector<16x1xf32> to vector<16x32xf32>
    %182 = arith.mulf %177, %181 : vector<16x32xf32>
    %183 = vector.broadcast %162 : vector<1x32xf32> to vector<16x32xf32>
    %184 = arith.mulf %182, %183 : vector<16x32xf32>
    %185 = vector.broadcast %164 : vector<1x32xf32> to vector<16x32xf32>
    %186 = arith.addf %184, %185 : vector<16x32xf32>
    %187 = arith.truncf %186 : vector<16x32xf32> to vector<16x32xbf16>
    %c0_62 = arith.constant 0 : index
    %c0_63 = arith.constant 0 : index
    %c0_64 = arith.constant 0 : index
    %188 = vector.load %arg11[%c0_62, %c0_63, %c0_64] : memref<2x32x128xbf16, #tpu.memory_space<vmem>>, vector<1x32x128xbf16>
    %189 = vector.shape_cast %188 : vector<1x32x128xbf16> to vector<32x128xbf16>
    %cst_65 = arith.constant dense<0.000000e+00> : vector<16x128xf32>
    %190 = tpu.matmul %187, %189, %cst_65 {dimension_numbers = #tpu.dot_dimension_numbers<[1], [0], [0], [1], [0, 0, 1, 1], [], []>} : vector<16x32xbf16>, vector<32x128xbf16>, vector<16x128xf32> -> vector<16x128xf32>
    %c0_66 = arith.constant 0 : index
    %c0_67 = arith.constant 0 : index
    %c0_68 = arith.constant 0 : index
    %191 = vector.load %arg12[%c0_66, %c0_67, %c0_68] : memref<2x1x128xf32, #tpu.memory_space<vmem>>, vector<1x1x128xf32>
    %192 = vector.shape_cast %191 : vector<1x1x128xf32> to vector<1x128xf32>
    %193 = vector.broadcast %192 : vector<1x128xf32> to vector<16x128xf32>
    %194 = arith.addf %190, %193 : vector<16x128xf32>
    %cst_69 = arith.constant 0.000000e+00 : f32
    %195 = vector.broadcast %cst_69 : f32 to vector<16x128xf32>
    %196 = arith.maximumf %194, %195 : vector<16x128xf32>
    %197 = arith.truncf %196 : vector<16x128xf32> to vector<16x128xbf16>
    %c0_70 = arith.constant 0 : index
    %c0_71 = arith.constant 0 : index
    %c0_72 = arith.constant 0 : index
    %198 = vector.load %arg13[%c0_70, %c0_71, %c0_72] : memref<2x128x32xbf16, #tpu.memory_space<vmem>>, vector<1x128x32xbf16>
    %199 = vector.shape_cast %198 : vector<1x128x32xbf16> to vector<128x32xbf16>
    %cst_73 = arith.constant dense<0.000000e+00> : vector<16x32xf32>
    %200 = tpu.matmul %197, %199, %cst_73 {dimension_numbers = #tpu.dot_dimension_numbers<[1], [0], [0], [1], [0, 0, 1, 1], [], []>} : vector<16x128xbf16>, vector<128x32xbf16>, vector<16x32xf32> -> vector<16x32xf32>
    %201 = arith.addf %160, %200 : vector<16x32xf32>
    %c0_74 = arith.constant 0 : index
    %c0_75 = arith.constant 0 : index
    %c0_76 = arith.constant 0 : index
    %202 = vector.load %arg14[%c0_74, %c0_75, %c0_76] : memref<2x1x32xf32, #tpu.memory_space<vmem>>, vector<1x1x32xf32>
    %203 = vector.shape_cast %202 : vector<1x1x32xf32> to vector<1x32xf32>
    %204 = vector.broadcast %203 : vector<1x32xf32> to vector<16x32xf32>
    %205 = arith.addf %201, %204 : vector<16x32xf32>
    %c1 = arith.constant 1 : index
    %c0_77 = arith.constant 0 : index
    %c0_78 = arith.constant 0 : index
    %206 = vector.load %arg4[%c1, %c0_77, %c0_78] : memref<2x1x32xf32, #tpu.memory_space<vmem>>, vector<1x1x32xf32>
    %207 = vector.shape_cast %206 : vector<1x1x32xf32> to vector<1x32xf32>
    %c1_79 = arith.constant 1 : index
    %c0_80 = arith.constant 0 : index
    %c0_81 = arith.constant 0 : index
    %208 = vector.load %arg5[%c1_79, %c0_80, %c0_81] : memref<2x1x32xf32, #tpu.memory_space<vmem>>, vector<1x1x32xf32>
    %209 = vector.shape_cast %208 : vector<1x1x32xf32> to vector<1x32xf32>
    %cst_82 = arith.constant dense<0.000000e+00> : vector<16xf32>
    %210 = vector.multi_reduction <add>, %205, %cst_82 [1] : vector<16x32xf32> to vector<16xf32>
    %211 = vector.shape_cast %210 : vector<16xf32> to vector<16x1xf32>
    %cst_83 = arith.constant 3.200000e+01 : f32
    %212 = vector.broadcast %cst_83 : f32 to vector<16x1xf32>
    %213 = arith.divf %211, %212 : vector<16x1xf32>
    %214 = vector.broadcast %213 : vector<16x1xf32> to vector<16x32xf32>
    %215 = arith.subf %205, %214 : vector<16x32xf32>
    %216 = arith.mulf %215, %215 : vector<16x32xf32>
    %cst_84 = arith.constant dense<0.000000e+00> : vector<16xf32>
    %217 = vector.multi_reduction <add>, %216, %cst_84 [1] : vector<16x32xf32> to vector<16xf32>
    %218 = vector.shape_cast %217 : vector<16xf32> to vector<16x1xf32>
    %cst_85 = arith.constant 3.200000e+01 : f32
    %219 = vector.broadcast %cst_85 : f32 to vector<16x1xf32>
    %220 = arith.divf %218, %219 : vector<16x1xf32>
    %221 = vector.broadcast %213 : vector<16x1xf32> to vector<16x32xf32>
    %222 = arith.subf %205, %221 : vector<16x32xf32>
    %cst_86 = arith.constant 9.99999974E-6 : f32
    %223 = vector.broadcast %cst_86 : f32 to vector<16x1xf32>
    %224 = arith.addf %220, %223 : vector<16x1xf32>
    %225 = math.rsqrt %224 : vector<16x1xf32>
    %226 = vector.broadcast %225 : vector<16x1xf32> to vector<16x32xf32>
    %227 = arith.mulf %222, %226 : vector<16x32xf32>
    %228 = vector.broadcast %207 : vector<1x32xf32> to vector<16x32xf32>
    %229 = arith.mulf %227, %228 : vector<16x32xf32>
    %230 = vector.broadcast %209 : vector<1x32xf32> to vector<16x32xf32>
    %231 = arith.addf %229, %230 : vector<16x32xf32>
    %232 = arith.truncf %231 : vector<16x32xf32> to vector<16x32xbf16>
    %c1_87 = arith.constant 1 : index
    %c0_88 = arith.constant 0 : index
    %c0_89 = arith.constant 0 : index
    %233 = vector.load %arg6[%c1_87, %c0_88, %c0_89] : memref<2x32x96xbf16, #tpu.memory_space<vmem>>, vector<1x32x96xbf16>
    %234 = vector.shape_cast %233 : vector<1x32x96xbf16> to vector<32x96xbf16>
    %cst_90 = arith.constant dense<0.000000e+00> : vector<16x96xf32>
    %235 = tpu.matmul %232, %234, %cst_90 {dimension_numbers = #tpu.dot_dimension_numbers<[1], [0], [0], [1], [0, 0, 1, 1], [], []>} : vector<16x32xbf16>, vector<32x96xbf16>, vector<16x96xf32> -> vector<16x96xf32>
    %236 = vector.shape_cast %235 : vector<16x96xf32> to vector<2x8x96xf32>
    %237 = vector.extract_strided_slice %236 {offsets = [0, 0, 0], sizes = [2, 8, 8], strides = [1, 1, 1]} : vector<2x8x96xf32> to vector<2x8x8xf32>
    %238 = arith.truncf %237 : vector<2x8x8xf32> to vector<2x8x8xbf16>
    %239 = vector.extract_strided_slice %236 {offsets = [0, 0, 32], sizes = [2, 8, 8], strides = [1, 1, 1]} : vector<2x8x96xf32> to vector<2x8x8xf32>
    %240 = arith.truncf %239 : vector<2x8x8xf32> to vector<2x8x8xbf16>
    %241 = vector.extract_strided_slice %236 {offsets = [0, 0, 64], sizes = [2, 8, 8], strides = [1, 1, 1]} : vector<2x8x96xf32> to vector<2x8x8xf32>
    %242 = arith.truncf %241 : vector<2x8x8xf32> to vector<2x8x8xbf16>
    "tpu.trace_start"() <{level = 10 : i32, message = "bqd,bkd->bqk"}> : () -> ()
    %cst_91 = arith.constant dense<0.000000e+00> : vector<2x8x8xf32>
    %243 = tpu.matmul %238, %240, %cst_91 {dimension_numbers = #tpu.dot_dimension_numbers<[2], [2], [1], [1], [0, 0, 0, 1, 1, 1], [0], [0]>} : vector<2x8x8xbf16>, vector<2x8x8xbf16>, vector<2x8x8xf32> -> vector<2x8x8xf32>
    "tpu.trace_stop"() : () -> ()
    %cst_92 = arith.constant 0.353553385 : f32
    %244 = vector.broadcast %cst_92 : f32 to vector<2x8x8xf32>
    %245 = arith.mulf %243, %244 : vector<2x8x8xf32>
    %246 = vector.shape_cast %14 : vector<8x8xi1> to vector<1x8x8xi1>
    %cst_93 = arith.constant -1.000000e+30 : f32
    %247 = vector.shape_cast %246 : vector<1x8x8xi1> to vector<1x8x8xi1>
    %248 = vector.broadcast %247 : vector<1x8x8xi1> to vector<2x8x8xi1>
    %249 = vector.broadcast %cst_93 : f32 to vector<2x8x8xf32>
    %250 = arith.select %248, %245, %249 : vector<2x8x8xi1>, vector<2x8x8xf32>
    %cst_94 = arith.constant dense<0xFF800000> : vector<2x8xf32>
    %251 = vector.multi_reduction <maximumf>, %250, %cst_94 [2] : vector<2x8x8xf32> to vector<2x8xf32>
    %252 = vector.shape_cast %251 : vector<2x8xf32> to vector<2x8x1xf32>
    %253 = vector.broadcast %252 : vector<2x8x1xf32> to vector<2x8x8xf32>
    %254 = arith.subf %250, %253 : vector<2x8x8xf32>
    %255 = math.exp %254 : vector<2x8x8xf32>
    %cst_95 = arith.constant dense<0.000000e+00> : vector<2x8xf32>
    %256 = vector.multi_reduction <add>, %255, %cst_95 [2] : vector<2x8x8xf32> to vector<2x8xf32>
    %257 = vector.shape_cast %256 : vector<2x8xf32> to vector<2x8x1xf32>
    %258 = tpu.reciprocal %257 {approx = true} : vector<2x8x1xf32> -> vector<2x8x1xf32>
    %259 = vector.broadcast %258 : vector<2x8x1xf32> to vector<2x8x8xf32>
    %260 = arith.mulf %255, %259 : vector<2x8x8xf32>
    %261 = arith.truncf %260 : vector<2x8x8xf32> to vector<2x8x8xbf16>
    "tpu.trace_start"() <{level = 10 : i32, message = "bqk,bkd->bqd"}> : () -> ()
    %cst_96 = arith.constant dense<0.000000e+00> : vector<2x8x8xf32>
    %262 = tpu.matmul %261, %242, %cst_96 {dimension_numbers = #tpu.dot_dimension_numbers<[2], [1], [1], [2], [0, 0, 0, 1, 1, 2], [0], [0]>} : vector<2x8x8xbf16>, vector<2x8x8xbf16>, vector<2x8x8xf32> -> vector<2x8x8xf32>
    "tpu.trace_stop"() : () -> ()
    %263 = vector.extract_strided_slice %236 {offsets = [0, 0, 8], sizes = [2, 8, 8], strides = [1, 1, 1]} : vector<2x8x96xf32> to vector<2x8x8xf32>
    %264 = arith.truncf %263 : vector<2x8x8xf32> to vector<2x8x8xbf16>
    %265 = vector.extract_strided_slice %236 {offsets = [0, 0, 40], sizes = [2, 8, 8], strides = [1, 1, 1]} : vector<2x8x96xf32> to vector<2x8x8xf32>
    %266 = arith.truncf %265 : vector<2x8x8xf32> to vector<2x8x8xbf16>
    %267 = vector.extract_strided_slice %236 {offsets = [0, 0, 72], sizes = [2, 8, 8], strides = [1, 1, 1]} : vector<2x8x96xf32> to vector<2x8x8xf32>
    %268 = arith.truncf %267 : vector<2x8x8xf32> to vector<2x8x8xbf16>
    "tpu.trace_start"() <{level = 10 : i32, message = "bqd,bkd->bqk"}> : () -> ()
    %cst_97 = arith.constant dense<0.000000e+00> : vector<2x8x8xf32>
    %269 = tpu.matmul %264, %266, %cst_97 {dimension_numbers = #tpu.dot_dimension_numbers<[2], [2], [1], [1], [0, 0, 0, 1, 1, 1], [0], [0]>} : vector<2x8x8xbf16>, vector<2x8x8xbf16>, vector<2x8x8xf32> -> vector<2x8x8xf32>
    "tpu.trace_stop"() : () -> ()
    %cst_98 = arith.constant 0.353553385 : f32
    %270 = vector.broadcast %cst_98 : f32 to vector<2x8x8xf32>
    %271 = arith.mulf %269, %270 : vector<2x8x8xf32>
    %272 = vector.shape_cast %14 : vector<8x8xi1> to vector<1x8x8xi1>
    %cst_99 = arith.constant -1.000000e+30 : f32
    %273 = vector.shape_cast %272 : vector<1x8x8xi1> to vector<1x8x8xi1>
    %274 = vector.broadcast %273 : vector<1x8x8xi1> to vector<2x8x8xi1>
    %275 = vector.broadcast %cst_99 : f32 to vector<2x8x8xf32>
    %276 = arith.select %274, %271, %275 : vector<2x8x8xi1>, vector<2x8x8xf32>
    %cst_100 = arith.constant dense<0xFF800000> : vector<2x8xf32>
    %277 = vector.multi_reduction <maximumf>, %276, %cst_100 [2] : vector<2x8x8xf32> to vector<2x8xf32>
    %278 = vector.shape_cast %277 : vector<2x8xf32> to vector<2x8x1xf32>
    %279 = vector.broadcast %278 : vector<2x8x1xf32> to vector<2x8x8xf32>
    %280 = arith.subf %276, %279 : vector<2x8x8xf32>
    %281 = math.exp %280 : vector<2x8x8xf32>
    %cst_101 = arith.constant dense<0.000000e+00> : vector<2x8xf32>
    %282 = vector.multi_reduction <add>, %281, %cst_101 [2] : vector<2x8x8xf32> to vector<2x8xf32>
    %283 = vector.shape_cast %282 : vector<2x8xf32> to vector<2x8x1xf32>
    %284 = tpu.reciprocal %283 {approx = true} : vector<2x8x1xf32> -> vector<2x8x1xf32>
    %285 = vector.broadcast %284 : vector<2x8x1xf32> to vector<2x8x8xf32>
    %286 = arith.mulf %281, %285 : vector<2x8x8xf32>
    %287 = arith.truncf %286 : vector<2x8x8xf32> to vector<2x8x8xbf16>
    "tpu.trace_start"() <{level = 10 : i32, message = "bqk,bkd->bqd"}> : () -> ()
    %cst_102 = arith.constant dense<0.000000e+00> : vector<2x8x8xf32>
    %288 = tpu.matmul %287, %268, %cst_102 {dimension_numbers = #tpu.dot_dimension_numbers<[2], [1], [1], [2], [0, 0, 0, 1, 1, 2], [0], [0]>} : vector<2x8x8xbf16>, vector<2x8x8xbf16>, vector<2x8x8xf32> -> vector<2x8x8xf32>
    "tpu.trace_stop"() : () -> ()
    %289 = vector.extract_strided_slice %236 {offsets = [0, 0, 16], sizes = [2, 8, 8], strides = [1, 1, 1]} : vector<2x8x96xf32> to vector<2x8x8xf32>
    %290 = arith.truncf %289 : vector<2x8x8xf32> to vector<2x8x8xbf16>
    %291 = vector.extract_strided_slice %236 {offsets = [0, 0, 48], sizes = [2, 8, 8], strides = [1, 1, 1]} : vector<2x8x96xf32> to vector<2x8x8xf32>
    %292 = arith.truncf %291 : vector<2x8x8xf32> to vector<2x8x8xbf16>
    %293 = vector.extract_strided_slice %236 {offsets = [0, 0, 80], sizes = [2, 8, 8], strides = [1, 1, 1]} : vector<2x8x96xf32> to vector<2x8x8xf32>
    %294 = arith.truncf %293 : vector<2x8x8xf32> to vector<2x8x8xbf16>
    "tpu.trace_start"() <{level = 10 : i32, message = "bqd,bkd->bqk"}> : () -> ()
    %cst_103 = arith.constant dense<0.000000e+00> : vector<2x8x8xf32>
    %295 = tpu.matmul %290, %292, %cst_103 {dimension_numbers = #tpu.dot_dimension_numbers<[2], [2], [1], [1], [0, 0, 0, 1, 1, 1], [0], [0]>} : vector<2x8x8xbf16>, vector<2x8x8xbf16>, vector<2x8x8xf32> -> vector<2x8x8xf32>
    "tpu.trace_stop"() : () -> ()
    %cst_104 = arith.constant 0.353553385 : f32
    %296 = vector.broadcast %cst_104 : f32 to vector<2x8x8xf32>
    %297 = arith.mulf %295, %296 : vector<2x8x8xf32>
    %298 = vector.shape_cast %14 : vector<8x8xi1> to vector<1x8x8xi1>
    %cst_105 = arith.constant -1.000000e+30 : f32
    %299 = vector.shape_cast %298 : vector<1x8x8xi1> to vector<1x8x8xi1>
    %300 = vector.broadcast %299 : vector<1x8x8xi1> to vector<2x8x8xi1>
    %301 = vector.broadcast %cst_105 : f32 to vector<2x8x8xf32>
    %302 = arith.select %300, %297, %301 : vector<2x8x8xi1>, vector<2x8x8xf32>
    %cst_106 = arith.constant dense<0xFF800000> : vector<2x8xf32>
    %303 = vector.multi_reduction <maximumf>, %302, %cst_106 [2] : vector<2x8x8xf32> to vector<2x8xf32>
    %304 = vector.shape_cast %303 : vector<2x8xf32> to vector<2x8x1xf32>
    %305 = vector.broadcast %304 : vector<2x8x1xf32> to vector<2x8x8xf32>
    %306 = arith.subf %302, %305 : vector<2x8x8xf32>
    %307 = math.exp %306 : vector<2x8x8xf32>
    %cst_107 = arith.constant dense<0.000000e+00> : vector<2x8xf32>
    %308 = vector.multi_reduction <add>, %307, %cst_107 [2] : vector<2x8x8xf32> to vector<2x8xf32>
    %309 = vector.shape_cast %308 : vector<2x8xf32> to vector<2x8x1xf32>
    %310 = tpu.reciprocal %309 {approx = true} : vector<2x8x1xf32> -> vector<2x8x1xf32>
    %311 = vector.broadcast %310 : vector<2x8x1xf32> to vector<2x8x8xf32>
    %312 = arith.mulf %307, %311 : vector<2x8x8xf32>
    %313 = arith.truncf %312 : vector<2x8x8xf32> to vector<2x8x8xbf16>
    "tpu.trace_start"() <{level = 10 : i32, message = "bqk,bkd->bqd"}> : () -> ()
    %cst_108 = arith.constant dense<0.000000e+00> : vector<2x8x8xf32>
    %314 = tpu.matmul %313, %294, %cst_108 {dimension_numbers = #tpu.dot_dimension_numbers<[2], [1], [1], [2], [0, 0, 0, 1, 1, 2], [0], [0]>} : vector<2x8x8xbf16>, vector<2x8x8xbf16>, vector<2x8x8xf32> -> vector<2x8x8xf32>
    "tpu.trace_stop"() : () -> ()
    %315 = vector.extract_strided_slice %236 {offsets = [0, 0, 24], sizes = [2, 8, 8], strides = [1, 1, 1]} : vector<2x8x96xf32> to vector<2x8x8xf32>
    %316 = arith.truncf %315 : vector<2x8x8xf32> to vector<2x8x8xbf16>
    %317 = vector.extract_strided_slice %236 {offsets = [0, 0, 56], sizes = [2, 8, 8], strides = [1, 1, 1]} : vector<2x8x96xf32> to vector<2x8x8xf32>
    %318 = arith.truncf %317 : vector<2x8x8xf32> to vector<2x8x8xbf16>
    %319 = vector.extract_strided_slice %236 {offsets = [0, 0, 88], sizes = [2, 8, 8], strides = [1, 1, 1]} : vector<2x8x96xf32> to vector<2x8x8xf32>
    %320 = arith.truncf %319 : vector<2x8x8xf32> to vector<2x8x8xbf16>
    "tpu.trace_start"() <{level = 10 : i32, message = "bqd,bkd->bqk"}> : () -> ()
    %cst_109 = arith.constant dense<0.000000e+00> : vector<2x8x8xf32>
    %321 = tpu.matmul %316, %318, %cst_109 {dimension_numbers = #tpu.dot_dimension_numbers<[2], [2], [1], [1], [0, 0, 0, 1, 1, 1], [0], [0]>} : vector<2x8x8xbf16>, vector<2x8x8xbf16>, vector<2x8x8xf32> -> vector<2x8x8xf32>
    "tpu.trace_stop"() : () -> ()
    %cst_110 = arith.constant 0.353553385 : f32
    %322 = vector.broadcast %cst_110 : f32 to vector<2x8x8xf32>
    %323 = arith.mulf %321, %322 : vector<2x8x8xf32>
    %324 = vector.shape_cast %14 : vector<8x8xi1> to vector<1x8x8xi1>
    %cst_111 = arith.constant -1.000000e+30 : f32
    %325 = vector.shape_cast %324 : vector<1x8x8xi1> to vector<1x8x8xi1>
    %326 = vector.broadcast %325 : vector<1x8x8xi1> to vector<2x8x8xi1>
    %327 = vector.broadcast %cst_111 : f32 to vector<2x8x8xf32>
    %328 = arith.select %326, %323, %327 : vector<2x8x8xi1>, vector<2x8x8xf32>
    %cst_112 = arith.constant dense<0xFF800000> : vector<2x8xf32>
    %329 = vector.multi_reduction <maximumf>, %328, %cst_112 [2] : vector<2x8x8xf32> to vector<2x8xf32>
    %330 = vector.shape_cast %329 : vector<2x8xf32> to vector<2x8x1xf32>
    %331 = vector.broadcast %330 : vector<2x8x1xf32> to vector<2x8x8xf32>
    %332 = arith.subf %328, %331 : vector<2x8x8xf32>
    %333 = math.exp %332 : vector<2x8x8xf32>
    %cst_113 = arith.constant dense<0.000000e+00> : vector<2x8xf32>
    %334 = vector.multi_reduction <add>, %333, %cst_113 [2] : vector<2x8x8xf32> to vector<2x8xf32>
    %335 = vector.shape_cast %334 : vector<2x8xf32> to vector<2x8x1xf32>
    %336 = tpu.reciprocal %335 {approx = true} : vector<2x8x1xf32> -> vector<2x8x1xf32>
    %337 = vector.broadcast %336 : vector<2x8x1xf32> to vector<2x8x8xf32>
    %338 = arith.mulf %333, %337 : vector<2x8x8xf32>
    %339 = arith.truncf %338 : vector<2x8x8xf32> to vector<2x8x8xbf16>
    "tpu.trace_start"() <{level = 10 : i32, message = "bqk,bkd->bqd"}> : () -> ()
    %cst_114 = arith.constant dense<0.000000e+00> : vector<2x8x8xf32>
    %340 = tpu.matmul %339, %320, %cst_114 {dimension_numbers = #tpu.dot_dimension_numbers<[2], [1], [1], [2], [0, 0, 0, 1, 1, 2], [0], [0]>} : vector<2x8x8xbf16>, vector<2x8x8xbf16>, vector<2x8x8xf32> -> vector<2x8x8xf32>
    "tpu.trace_stop"() : () -> ()
    %341 = tpu.concatenate %262, %288, %314, %340 in 2 : vector<2x8x8xf32>, vector<2x8x8xf32>, vector<2x8x8xf32>, vector<2x8x8xf32> -> vector<2x8x32xf32>
    %342 = vector.shape_cast %341 : vector<2x8x32xf32> to vector<16x32xf32>
    %343 = arith.truncf %342 : vector<16x32xf32> to vector<16x32xbf16>
    %c1_115 = arith.constant 1 : index
    %c0_116 = arith.constant 0 : index
    %c0_117 = arith.constant 0 : index
    %344 = vector.load %arg7[%c1_115, %c0_116, %c0_117] : memref<2x32x32xbf16, #tpu.memory_space<vmem>>, vector<1x32x32xbf16>
    %345 = vector.shape_cast %344 : vector<1x32x32xbf16> to vector<32x32xbf16>
    %cst_118 = arith.constant dense<0.000000e+00> : vector<16x32xf32>
    %346 = tpu.matmul %343, %345, %cst_118 {dimension_numbers = #tpu.dot_dimension_numbers<[1], [0], [0], [1], [0, 0, 1, 1], [], []>} : vector<16x32xbf16>, vector<32x32xbf16>, vector<16x32xf32> -> vector<16x32xf32>
    %347 = arith.addf %205, %346 : vector<16x32xf32>
    %c1_119 = arith.constant 1 : index
    %c0_120 = arith.constant 0 : index
    %c0_121 = arith.constant 0 : index
    %348 = vector.load %arg8[%c1_119, %c0_120, %c0_121] : memref<2x1x32xf32, #tpu.memory_space<vmem>>, vector<1x1x32xf32>
    %349 = vector.shape_cast %348 : vector<1x1x32xf32> to vector<1x32xf32>
    %350 = vector.broadcast %349 : vector<1x32xf32> to vector<16x32xf32>
    %351 = arith.addf %347, %350 : vector<16x32xf32>
    %c1_122 = arith.constant 1 : index
    %c0_123 = arith.constant 0 : index
    %c0_124 = arith.constant 0 : index
    %352 = vector.load %arg9[%c1_122, %c0_123, %c0_124] : memref<2x1x32xf32, #tpu.memory_space<vmem>>, vector<1x1x32xf32>
    %353 = vector.shape_cast %352 : vector<1x1x32xf32> to vector<1x32xf32>
    %c1_125 = arith.constant 1 : index
    %c0_126 = arith.constant 0 : index
    %c0_127 = arith.constant 0 : index
    %354 = vector.load %arg10[%c1_125, %c0_126, %c0_127] : memref<2x1x32xf32, #tpu.memory_space<vmem>>, vector<1x1x32xf32>
    %355 = vector.shape_cast %354 : vector<1x1x32xf32> to vector<1x32xf32>
    %cst_128 = arith.constant dense<0.000000e+00> : vector<16xf32>
    %356 = vector.multi_reduction <add>, %351, %cst_128 [1] : vector<16x32xf32> to vector<16xf32>
    %357 = vector.shape_cast %356 : vector<16xf32> to vector<16x1xf32>
    %cst_129 = arith.constant 3.200000e+01 : f32
    %358 = vector.broadcast %cst_129 : f32 to vector<16x1xf32>
    %359 = arith.divf %357, %358 : vector<16x1xf32>
    %360 = vector.broadcast %359 : vector<16x1xf32> to vector<16x32xf32>
    %361 = arith.subf %351, %360 : vector<16x32xf32>
    %362 = arith.mulf %361, %361 : vector<16x32xf32>
    %cst_130 = arith.constant dense<0.000000e+00> : vector<16xf32>
    %363 = vector.multi_reduction <add>, %362, %cst_130 [1] : vector<16x32xf32> to vector<16xf32>
    %364 = vector.shape_cast %363 : vector<16xf32> to vector<16x1xf32>
    %cst_131 = arith.constant 3.200000e+01 : f32
    %365 = vector.broadcast %cst_131 : f32 to vector<16x1xf32>
    %366 = arith.divf %364, %365 : vector<16x1xf32>
    %367 = vector.broadcast %359 : vector<16x1xf32> to vector<16x32xf32>
    %368 = arith.subf %351, %367 : vector<16x32xf32>
    %cst_132 = arith.constant 9.99999974E-6 : f32
    %369 = vector.broadcast %cst_132 : f32 to vector<16x1xf32>
    %370 = arith.addf %366, %369 : vector<16x1xf32>
    %371 = math.rsqrt %370 : vector<16x1xf32>
    %372 = vector.broadcast %371 : vector<16x1xf32> to vector<16x32xf32>
    %373 = arith.mulf %368, %372 : vector<16x32xf32>
    %374 = vector.broadcast %353 : vector<1x32xf32> to vector<16x32xf32>
    %375 = arith.mulf %373, %374 : vector<16x32xf32>
    %376 = vector.broadcast %355 : vector<1x32xf32> to vector<16x32xf32>
    %377 = arith.addf %375, %376 : vector<16x32xf32>
    %378 = arith.truncf %377 : vector<16x32xf32> to vector<16x32xbf16>
    %c1_133 = arith.constant 1 : index
    %c0_134 = arith.constant 0 : index
    %c0_135 = arith.constant 0 : index
    %379 = vector.load %arg11[%c1_133, %c0_134, %c0_135] : memref<2x32x128xbf16, #tpu.memory_space<vmem>>, vector<1x32x128xbf16>
    %380 = vector.shape_cast %379 : vector<1x32x128xbf16> to vector<32x128xbf16>
    %cst_136 = arith.constant dense<0.000000e+00> : vector<16x128xf32>
    %381 = tpu.matmul %378, %380, %cst_136 {dimension_numbers = #tpu.dot_dimension_numbers<[1], [0], [0], [1], [0, 0, 1, 1], [], []>} : vector<16x32xbf16>, vector<32x128xbf16>, vector<16x128xf32> -> vector<16x128xf32>
    %c1_137 = arith.constant 1 : index
    %c0_138 = arith.constant 0 : index
    %c0_139 = arith.constant 0 : index
    %382 = vector.load %arg12[%c1_137, %c0_138, %c0_139] : memref<2x1x128xf32, #tpu.memory_space<vmem>>, vector<1x1x128xf32>
    %383 = vector.shape_cast %382 : vector<1x1x128xf32> to vector<1x128xf32>
    %384 = vector.broadcast %383 : vector<1x128xf32> to vector<16x128xf32>
    %385 = arith.addf %381, %384 : vector<16x128xf32>
    %cst_140 = arith.constant 0.000000e+00 : f32
    %386 = vector.broadcast %cst_140 : f32 to vector<16x128xf32>
    %387 = arith.maximumf %385, %386 : vector<16x128xf32>
    %388 = arith.truncf %387 : vector<16x128xf32> to vector<16x128xbf16>
    %c1_141 = arith.constant 1 : index
    %c0_142 = arith.constant 0 : index
    %c0_143 = arith.constant 0 : index
    %389 = vector.load %arg13[%c1_141, %c0_142, %c0_143] : memref<2x128x32xbf16, #tpu.memory_space<vmem>>, vector<1x128x32xbf16>
    %390 = vector.shape_cast %389 : vector<1x128x32xbf16> to vector<128x32xbf16>
    %cst_144 = arith.constant dense<0.000000e+00> : vector<16x32xf32>
    %391 = tpu.matmul %388, %390, %cst_144 {dimension_numbers = #tpu.dot_dimension_numbers<[1], [0], [0], [1], [0, 0, 1, 1], [], []>} : vector<16x128xbf16>, vector<128x32xbf16>, vector<16x32xf32> -> vector<16x32xf32>
    %392 = arith.addf %351, %391 : vector<16x32xf32>
    %c1_145 = arith.constant 1 : index
    %c0_146 = arith.constant 0 : index
    %c0_147 = arith.constant 0 : index
    %393 = vector.load %arg14[%c1_145, %c0_146, %c0_147] : memref<2x1x32xf32, #tpu.memory_space<vmem>>, vector<1x1x32xf32>
    %394 = vector.shape_cast %393 : vector<1x1x32xf32> to vector<1x32xf32>
    %395 = vector.broadcast %394 : vector<1x32xf32> to vector<16x32xf32>
    %396 = arith.addf %392, %395 : vector<16x32xf32>
    %c0_148 = arith.constant 0 : index
    %c0_149 = arith.constant 0 : index
    %397 = vector.load %arg15[%c0_148, %c0_149] : memref<1x32xf32, #tpu.memory_space<vmem>>, vector<1x32xf32>
    %c0_150 = arith.constant 0 : index
    %c0_151 = arith.constant 0 : index
    %398 = vector.load %arg16[%c0_150, %c0_151] : memref<1x32xf32, #tpu.memory_space<vmem>>, vector<1x32xf32>
    %cst_152 = arith.constant dense<0.000000e+00> : vector<16xf32>
    %399 = vector.multi_reduction <add>, %396, %cst_152 [1] : vector<16x32xf32> to vector<16xf32>
    %400 = vector.shape_cast %399 : vector<16xf32> to vector<16x1xf32>
    %cst_153 = arith.constant 3.200000e+01 : f32
    %401 = vector.broadcast %cst_153 : f32 to vector<16x1xf32>
    %402 = arith.divf %400, %401 : vector<16x1xf32>
    %403 = vector.broadcast %402 : vector<16x1xf32> to vector<16x32xf32>
    %404 = arith.subf %396, %403 : vector<16x32xf32>
    %405 = arith.mulf %404, %404 : vector<16x32xf32>
    %cst_154 = arith.constant dense<0.000000e+00> : vector<16xf32>
    %406 = vector.multi_reduction <add>, %405, %cst_154 [1] : vector<16x32xf32> to vector<16xf32>
    %407 = vector.shape_cast %406 : vector<16xf32> to vector<16x1xf32>
    %cst_155 = arith.constant 3.200000e+01 : f32
    %408 = vector.broadcast %cst_155 : f32 to vector<16x1xf32>
    %409 = arith.divf %407, %408 : vector<16x1xf32>
    %410 = vector.broadcast %402 : vector<16x1xf32> to vector<16x32xf32>
    %411 = arith.subf %396, %410 : vector<16x32xf32>
    %cst_156 = arith.constant 9.99999974E-6 : f32
    %412 = vector.broadcast %cst_156 : f32 to vector<16x1xf32>
    %413 = arith.addf %409, %412 : vector<16x1xf32>
    %414 = math.rsqrt %413 : vector<16x1xf32>
    %415 = vector.broadcast %414 : vector<16x1xf32> to vector<16x32xf32>
    %416 = arith.mulf %411, %415 : vector<16x32xf32>
    %417 = vector.broadcast %397 : vector<1x32xf32> to vector<16x32xf32>
    %418 = arith.mulf %416, %417 : vector<16x32xf32>
    %419 = vector.broadcast %398 : vector<1x32xf32> to vector<16x32xf32>
    %420 = arith.addf %418, %419 : vector<16x32xf32>
    %421 = arith.truncf %420 : vector<16x32xf32> to vector<16x32xbf16>
    %c0_157 = arith.constant 0 : index
    %c0_158 = arith.constant 0 : index
    %422 = vector.load %arg17[%c0_157, %c0_158] : memref<32x128xbf16, #tpu.memory_space<vmem>>, vector<32x128xbf16>
    %cst_159 = arith.constant dense<0.000000e+00> : vector<16x128xf32>
    %423 = tpu.matmul %421, %422, %cst_159 {dimension_numbers = #tpu.dot_dimension_numbers<[1], [0], [0], [1], [0, 0, 1, 1], [], []>} : vector<16x32xbf16>, vector<32x128xbf16>, vector<16x128xf32> -> vector<16x128xf32>
    %c0_160 = arith.constant 0 : index
    %c0_161 = arith.constant 0 : index
    %424 = vector.load %arg18[%c0_160, %c0_161] : memref<1x128xf32, #tpu.memory_space<vmem>>, vector<1x128xf32>
    %425 = vector.broadcast %424 : vector<1x128xf32> to vector<16x128xf32>
    %426 = arith.addf %423, %425 : vector<16x128xf32>
    %c0_162 = arith.constant 0 : index
    %c0_163 = arith.constant 0 : index
    %427 = vector.load %arg19[%c0_162, %c0_163] : memref<16x128xf32, #tpu.memory_space<vmem>>, vector<16x128xf32>
    tpu.vector_store %arg19[%c0_162, %c0_163], %426 {strides = array<i32>} : memref<16x128xf32, #tpu.memory_space<vmem>>, vector<16x128xf32>,
    return
  }
  func.func @transform_0(%arg0: i32) -> (i32, i32) {
    %c0_i32 = arith.constant 0 : i32
    %c0_i32_0 = arith.constant 0 : i32
    return %arg0, %c0_i32 : i32, i32
  }
  func.func @transform_1(%arg0: i32) -> (i32, i32) {
    %c0_i32 = arith.constant 0 : i32
    %c0_i32_0 = arith.constant 0 : i32
    %c0_i32_1 = arith.constant 0 : i32
    return %c0_i32, %c0_i32_0 : i32, i32
  }
  func.func @transform_2(%arg0: i32) -> (i32, i32) {
    %c0_i32 = arith.constant 0 : i32
    %c0_i32_0 = arith.constant 0 : i32
    %c0_i32_1 = arith.constant 0 : i32
    return %c0_i32, %c0_i32_0 : i32, i32
  }
  func.func @transform_3(%arg0: i32) -> (i32, i32, i32) {
    %c0_i32 = arith.constant 0 : i32
    %c0_i32_0 = arith.constant 0 : i32
    %c0_i32_1 = arith.constant 0 : i32
    %c0_i32_2 = arith.constant 0 : i32
    return %c0_i32, %c0_i32_0, %c0_i32_1 : i32, i32, i32
  }
  func.func @transform_4(%arg0: i32) -> (i32, i32, i32) {
    %c0_i32 = arith.constant 0 : i32
    %c0_i32_0 = arith.constant 0 : i32
    %c0_i32_1 = arith.constant 0 : i32
    %c0_i32_2 = arith.constant 0 : i32
    return %c0_i32, %c0_i32_0, %c0_i32_1 : i32, i32, i32
  }
  func.func @transform_5(%arg0: i32) -> (i32, i32, i32) {
    %c0_i32 = arith.constant 0 : i32
    %c0_i32_0 = arith.constant 0 : i32
    %c0_i32_1 = arith.constant 0 : i32
    %c0_i32_2 = arith.constant 0 : i32
    return %c0_i32, %c0_i32_0, %c0_i32_1 : i32, i32, i32
  }
  func.func @transform_6(%arg0: i32) -> (i32, i32, i32) {
    %c0_i32 = arith.constant 0 : i32
    %c0_i32_0 = arith.constant 0 : i32
    %c0_i32_1 = arith.constant 0 : i32
    %c0_i32_2 = arith.constant 0 : i32
    return %c0_i32, %c0_i32_0, %c0_i32_1 : i32, i32, i32
  }
  func.func @transform_7(%arg0: i32) -> (i32, i32, i32) {
    %c0_i32 = arith.constant 0 : i32
    %c0_i32_0 = arith.constant 0 : i32
    %c0_i32_1 = arith.constant 0 : i32
    %c0_i32_2 = arith.constant 0 : i32
    return %c0_i32, %c0_i32_0, %c0_i32_1 : i32, i32, i32
  }
  func.func @transform_8(%arg0: i32) -> (i32, i32, i32) {
    %c0_i32 = arith.constant 0 : i32
    %c0_i32_0 = arith.constant 0 : i32
    %c0_i32_1 = arith.constant 0 : i32
    %c0_i32_2 = arith.constant 0 : i32
    return %c0_i32, %c0_i32_0, %c0_i32_1 : i32, i32, i32
  }
  func.func @transform_9(%arg0: i32) -> (i32, i32, i32) {
    %c0_i32 = arith.constant 0 : i32
    %c0_i32_0 = arith.constant 0 : i32
    %c0_i32_1 = arith.constant 0 : i32
    %c0_i32_2 = arith.constant 0 : i32
    return %c0_i32, %c0_i32_0, %c0_i32_1 : i32, i32, i32
  }
  func.func @transform_10(%arg0: i32) -> (i32, i32, i32) {
    %c0_i32 = arith.constant 0 : i32
    %c0_i32_0 = arith.constant 0 : i32
    %c0_i32_1 = arith.constant 0 : i32
    %c0_i32_2 = arith.constant 0 : i32
    return %c0_i32, %c0_i32_0, %c0_i32_1 : i32, i32, i32
  }
  func.func @transform_11(%arg0: i32) -> (i32, i32, i32) {
    %c0_i32 = arith.constant 0 : i32
    %c0_i32_0 = arith.constant 0 : i32
    %c0_i32_1 = arith.constant 0 : i32
    %c0_i32_2 = arith.constant 0 : i32
    return %c0_i32, %c0_i32_0, %c0_i32_1 : i32, i32, i32
  }
  func.func @transform_12(%arg0: i32) -> (i32, i32, i32) {
    %c0_i32 = arith.constant 0 : i32
    %c0_i32_0 = arith.constant 0 : i32
    %c0_i32_1 = arith.constant 0 : i32
    %c0_i32_2 = arith.constant 0 : i32
    return %c0_i32, %c0_i32_0, %c0_i32_1 : i32, i32, i32
  }
  func.func @transform_13(%arg0: i32) -> (i32, i32, i32) {
    %c0_i32 = arith.constant 0 : i32
    %c0_i32_0 = arith.constant 0 : i32
    %c0_i32_1 = arith.constant 0 : i32
    %c0_i32_2 = arith.constant 0 : i32
    return %c0_i32, %c0_i32_0, %c0_i32_1 : i32, i32, i32
  }
  func.func @transform_14(%arg0: i32) -> (i32, i32) {
    %c0_i32 = arith.constant 0 : i32
    %c0_i32_0 = arith.constant 0 : i32
    %c0_i32_1 = arith.constant 0 : i32
    return %c0_i32, %c0_i32_0 : i32, i32
  }
  func.func @transform_15(%arg0: i32) -> (i32, i32) {
    %c0_i32 = arith.constant 0 : i32
    %c0_i32_0 = arith.constant 0 : i32
    %c0_i32_1 = arith.constant 0 : i32
    return %c0_i32, %c0_i32_0 : i32, i32
  }
  func.func @transform_16(%arg0: i32) -> (i32, i32) {
    %c0_i32 = arith.constant 0 : i32
    %c0_i32_0 = arith.constant 0 : i32
    %c0_i32_1 = arith.constant 0 : i32
    return %c0_i32, %c0_i32_0 : i32, i32
  }
  func.func @transform_17(%arg0: i32) -> (i32, i32) {
    %c0_i32 = arith.constant 0 : i32
    %c0_i32_0 = arith.constant 0 : i32
    %c0_i32_1 = arith.constant 0 : i32
    return %c0_i32, %c0_i32_0 : i32, i32
  }
  func.func @transform_18(%arg0: i32) -> (i32, i32) {
    %c0_i32 = arith.constant 0 : i32
    %c0_i32_0 = arith.constant 0 : i32
    return %arg0, %c0_i32 : i32, i32
  }
}

</mosaic_0001>

<bundles_post_ra>
// kernel: tpu_custom_call.1
= control target key start
LH: loop header
LB: loop body
LE: loop exit
PB: predicated region body
PF: predicated region fallthrough
CT: control target
= control target key end

     0   :  { %s4487_s0 = inlined_call_operand.vmem [shape: s32[16,1], index: 0, kind: input, shape index: {}]   ;;  %s4488_s1 = inlined_call_operand.vmem [shape: f32[64,32], index: 1, kind: input, shape index: {}]   ;;  %s4489_s2 = inlined_call_operand.vmem [shape: f32[16,32], index: 2, kind: input, shape index: {}]   ;;  %s4490_s3 = inlined_call_operand.vmem [shape: f32[2,1,32], index: 3, kind: input, shape index: {}]   ;;  %s4491_s4 = inlined_call_operand.vmem [shape: f32[2,1,32], index: 4, kind: input, shape index: {}]   ;;  %s4492_s5 = inlined_call_operand.vmem [shape: bf16[2,32,96], index: 5, kind: input, shape index: {}]   ;;  %s4493_s6 = inlined_call_operand.vmem [shape: bf16[2,32,32], index: 6, kind: input, shape index: {}]   ;;  %s4494_s7 = inlined_call_operand.vmem [shape: f32[2,1,32], index: 7, kind: input, shape index: {}]   ;;  %s4495_s8 = inlined_call_operand.vmem [shape: f32[2,1,32], index: 8, kind: input, shape index: {}]   ;;  %s4496_s9 = inlined_call_operand.vmem [shape: f32[2,1,32], index: 9, kind: input, shape index: {}]   ;;  %s4497_s10 = inlined_call_operand.vmem [shape: bf16[2,32,128], index: 10, kind: input, shape index: {}]   ;;  %s4498_s11 = inlined_call_operand.vmem [shape: f32[2,1,128], index: 11, kind: input, shape index: {}]   ;;  %s4499_s12 = inlined_call_operand.vmem [shape: bf16[2,128,32], index: 12, kind: input, shape index: {}]   ;;  %s4500_s13 = inlined_call_operand.vmem [shape: f32[2,1,32], index: 13, kind: input, shape index: {}]   ;;  %s4501_s14 = inlined_call_operand.vmem [shape: f32[1,32], index: 14, kind: input, shape index: {}]   ;;  %s4502_s15 = inlined_call_operand.vmem [shape: f32[1,32], index: 15, kind: input, shape index: {}]   ;;  %s4503_s16 = inlined_call_operand.vmem [shape: bf16[32,128], index: 16, kind: input, shape index: {}]   ;;  %s4504_s17 = inlined_call_operand.vmem [shape: f32[1,128], index: 17, kind: input, shape index: {}]   ;;  %s4505_s18 = inlined_call_operand.hbm [shape: f32[16,128], index: 18, kind: output, shape index: {}]  }
   0x1   :  { %4520 = sst [smem:[#allocation5_spill]] %s4487_s0 }
   0x2   :  { %4521 = sst [smem:[#allocation6_spill]] %s4488_s1 }
   0x3   :  { %4522 = sst [smem:[#allocation7_spill]] %s4489_s2 }
   0x4   :  { %4523 = sst [smem:[#allocation8_spill]] %s4500_s13 }
   0x5   :  { %s4524_s29 = sld [smem:[#allocation5_spill]]  ;;  %s4525_s13 = sld [smem:[#allocation6_spill]]  ;;  %v3677_v2 = vmov 0   ;;  %v3678_v3 = vmov 0.0   ;;  %vm3679_vm0 = vmmov 0  }
   0x6   :  { %3508 = vset.pattern.permute.xlu0 %v3677_v2  ;;  %3189 = vmatprep.subr.bf16.mxu1 %v3678_v3 }
   0x7   :  { %3215 = vmatprep.subr.bf16.mxu0 %v3678_v3  ;;  %3197 = vmatprep.mubr.msk.bf16.mxu1 %vm3679_vm0, %v3678_v3 }
   0x8   :  { %3217 = vmatprep.mubr.msk.bf16.mxu0 %vm3679_vm0, %v3678_v3 }
   0xb   :  { %v61_v0 = vld [vmem:[%s4524_s29] sm:$0xff]  ;;  %v79_v4 = vld [vmem:[%s4525_s13 + $0x8] sm:$0xff]  ;;  %v80_v5 = vld [vmem:[%s4525_s13 + $0x10] sm:$0xff] }
   0xc   :  { %v78_v1 = vld [vmem:[%s4525_s13] sm:$0xff]  ;;  %v81_v6 = vld [vmem:[%s4525_s13 + $0x18] sm:$0xff]  ;;  %66 = vperm.xlu0 %3508, %v61_v0   ;;  %v62_v7 = vld [vmem:[%s4524_s29 + $0x8] sm:$0xff] }
   0xd   :  { %v86_v8 = vpack.c.bf16 %v79_v4, %v78_v1  ;;  %v87_v9 = vpack.c.bf16 %v81_v6, %v80_v5  ;;  %v82_v10 = vld [vmem:[%s4525_s13 + $0x20] sm:$0xff]  ;;  %v83_v11 = vld [vmem:[%s4525_s13 + $0x28] sm:$0xff]  ;;  %v84_v12 = vld [vmem:[%s4525_s13 + $0x30] sm:$0xff] }
   0xe   :  { %v88_v13 = vpack.c.bf16 %v83_v11, %v82_v10  ;;  %v85_v14 = vld [vmem:[%s4525_s13 + $0x38] sm:$0xff] }
   0xf   :  { %3190 = vmatpush3.bf16.msra.mxu1 %v86_v8  ;;  %v89_v15 = vpack.c.bf16 %v85_v14, %v84_v12 }
  0x10   :  { %3191 = vmatprep.subr.bf16.mxu1 %v3678_v3  ;;  %69 = vperm.xlu0 %3508, %v62_v7  }
  0x13   :  { %3192 = vmatpush3.bf16.msra.mxu1 %v87_v9 }
  0x14   :  { %3193 = vmatprep.subr.bf16.mxu1 %v3678_v3 }
  0x17   :  { %3194 = vmatpush3.bf16.msra.mxu1 %v88_v13 }
  0x18   :  { %3195 = vmatprep.subr.bf16.mxu1 %v3678_v3 }
  0x1b   :  { %3196 = vmatpush3.bf16.msra.mxu1 %v89_v15 }
  0x1c   :  { %3201 = vmatprep.subr.bf16.mxu1 %v3678_v3 }
  0x1d   :  { %23 = vsyncpa [#allocation3], 0  ;;  %v63_v16 = vlaneseq  ;;  %vm92_vm3 = vcmask 523264   ;;  %s4526_s20 = sld [smem:[#allocation7_spill]]  ;;  %vm142_vm4 = vcmask 261120   ;;  %v3539_v43 = vld [vmem:[%s4492_s5] sm:$0xff]  }
  0x1e   :  { %v3540_v44 = vld [vmem:[%s4492_s5 + $0x8] sm:$0xff]   ;;  %v2960_v53 = vld [vmem:[%s4490_s3] ss:$0 sm:$0xff]  ;;  %s3680_s0 = smov 96   ;;  %vm252_vm5 = vcmask 64512   ;;  %s3681_s29 = smov 64  }
  0x1f   :  { %v3832_v17 = vand.u32 127, %v63_v16  ;;  %v2961_v57 = vld [vmem:[%s4491_s4] ss:$0 sm:$0xff]  ;;  %v138_v9 = vshrl.u32 %v63_v16, 7  ;;  %s3682_s19 = smov 88   ;;  %vm383_vm7 = vcmask 1043456  }
  0x20   :  { %s3683_s13 = smov 120   ;;  %s3684_s1 = smov 56   ;;  %vm1173_vm8 = vcmask 130048   ;;  %vm1176_vm9 = vcmask 195584  }
  0x21   :  { %vm3897_vm6 = vcmp.ge.s32.totalorder %v138_v9, %v3832_v17  ;;  %s3686_s21 = smov 112   ;;  %s3687_s22 = smov 48  }
  0x22   :  { %s4518_s2 = smov 72   ;;  %s4516_s23 = smov 104  }
  0x23   :  { %v90_v23 = vld [vmem:[%s4526_s20] sm:$0xff]  ;;  %v91_v25 = vld [vmem:[%s4526_s20 + $0x8] sm:$0xff]  ;;  %s3685_s20 = smov 80   ;;  %s4514_s24 = smov 40  }
  0x24   :  { %s4512_s25 = smov 8   ;;  %s4510_s26 = smov 16  }
  0x25   :  { %s4511_s27 = smov 24  }
  0x8b   :  { %v67_v18 = vpop.permute.xlu0 %66 }
  0x8c   :  { %vm71_vm1 = vcmp.eq.s32.totalorder %v67_v18, %v3832_v17 }
  0x8d   :  { %v2957_v20 = vsel %vm71_vm1, 1.0, %v3678_v3 }
  0x8f   :  { %v70_v19 = vpop.permute.xlu0 %69 }
  0x90   :  { %vm72_vm2 = vcmp.eq.s32.totalorder %v70_v19, %v3832_v17 }
  0x91   :  { %v2958_v21 = vsel %vm72_vm2, 1.0, %v3678_v3 }
  0x92   :  { %v77_v22 = vpack.c.bf16 %v2958_v21, %v2957_v20 }
  0x94   :  { %3198 = vmatmul.mubr.msk.bf16.vlgmr.msra.gmra.mrb[0].mxu1 %vm92_vm3, %v77_v22 }
  0x95   :  { %3205 = vmatprep.mubr.msk.bf16.mxu1 %vm3679_vm0, %v3678_v3  ;;  %3202 = vmatpush3.bf16.msra.mxu1 %v3539_v43 }
  0x96   :  { %3203 = vmatprep.subr.bf16.mxu1 %v3678_v3 }
  0x99   :  { %3204 = vmatpush3.bf16.msra.mxu1 %v3540_v44 }
  0x9a   :  { %3209 = vmatprep.subr.bf16.mxu1 %v3678_v3 }
 0x167   :  { %v130_v24 = vpop.f32.mrb[0].mxu1 }
 0x168   :  { %v3846_v26 = vadd.f32 %v130_v24, %v90_v23  ;;  %v3199_v27 = vpop.f32.mrb[1].mxu1 }
 0x169   :  { %v133_v28 = vpop.f32.mrb[2].mxu1 }
 0x16a   :  { %v3848_v29 = vadd.f32 %v133_v28, %v91_v25  ;;  %v3200_v30 = vpop.f32.mrb[3].mxu1  ;;  %v143_v31 = vsel %vm142_vm4, %v3846_v26, 0.0 }
 0x16b   :  { %144 = vadd.xlane.f32.xlu1 %v143_v31 }
 0x16c   :  { %v146_v32 = vsel %vm142_vm4, %v3848_v29, 0.0 }
 0x16f   :  { %147 = vadd.xlane.f32.xlu1 %v146_v32 }
 0x1f8   :  { %v145_v33 = vpop.xlane.xlu1 %144 }
 0x1f9   :  { %v150_v34 = vmul.f32 0.03125, %v145_v33 }
 0x1fb   :  { %v152_v35 = vsub.f32 %v3846_v26, %v150_v34 }
 0x1fc   :  { %v148_v36 = vpop.xlane.xlu1 %147 }
 0x1fd   :  { %v151_v37 = vmul.f32 0.03125, %v148_v36  ;;  %v154_v38 = vmul.f32 %v152_v35, %v152_v35 }
 0x1ff   :  { %v153_v39 = vsub.f32 %v3848_v29, %v151_v37  ;;  %v156_v40 = vsel %vm142_vm4, %v154_v38, 0.0 }
 0x200   :  { %157 = vadd.xlane.f32.xlu0 %v156_v40 }
 0x201   :  { %v155_v41 = vmul.f32 %v153_v39, %v153_v39 }
 0x203   :  { %v159_v42 = vsel %vm142_vm4, %v155_v41, 0.0 }
 0x204   :  { %160 = vadd.xlane.f32.xlu1 %v159_v42 }
 0x28d   :  { %v158_v45 = vpop.xlane.xlu0 %157 }
 0x28e   :  { %v162_v46 = vmul.f32 0.03125, %v158_v45 }
 0x290   :  { %v164_v47 = vadd.f32 1e-05, %v162_v46 }
 0x291   :  { %v161_v48 = vpop.xlane.xlu1 %160 }
 0x292   :  { %3569 = vrsqrt.f32 %v164_v47  ;;  %v163_v49 = vmul.f32 0.03125, %v161_v48 }
 0x294   :  { %v165_v50 = vadd.f32 1e-05, %v163_v49 }
 0x296   :  { %3571 = vrsqrt.f32 %v165_v50 }
 0x29c   :  { %v3570_v51 = vpop.eup %3569 }
 0x29d   :  { %v168_v52 = vmul.f32 %v3570_v51, %v152_v35 }
 0x29f   :  { %v176_v56 = vmul.f32 %v2960_v53, %v168_v52 }
 0x2a0   :  { %v3572_v54 = vpop.eup %3571 }
 0x2a1   :  { %v169_v55 = vmul.f32 %v3572_v54, %v153_v39  ;;  %v184_v59 = vadd.f32 %v2961_v57, %v176_v56 }
 0x2a3   :  { %v177_v58 = vmul.f32 %v2960_v53, %v169_v55 }
 0x2a5   :  { %v185_v60 = vadd.f32 %v2961_v57, %v177_v58 }
 0x2a7   :  { %v186_v61 = vpack.c.bf16 %v185_v60, %v184_v59 }
 0x2a9   :  { %3206 = vmatmul.mubr.msk.bf16.vlgmr.msra.gmra.mrb[4].mxu1 %vm142_vm4, %v186_v61 }
 0x2aa   :  { %3211 = vmatprep.mubr.msk.bf16.mxu1 %vm3679_vm0, %v3678_v3 }
 0x37c   :  { %v240_v62 = vpop.f32.mrb[4].mxu1 }
 0x37d   :  { %v3875_v63 = vpack.c.bf16 %v240_v62, %v240_v62  ;;  %v3207_v0 = vpop.f32.mrb[5].mxu1 }
 0x37e   :  { %v243_v1 = vpop.f32.mrb[6].mxu1 }
 0x37f   :  { %250 = vrot.lane.b32.xlu1 %v3875_v63, %s3680_s0  ;;  %v3208_v2 = vpop.f32.mrb[7].mxu1  ;;  %v3879_v4 = vpack.c.bf16 %v243_v1, %v243_v1 }
 0x383   :  { %300 = vrot.lane.b32.xlu1 %v3879_v4, %s3680_s0 }
 0x3f1   :  { %v251_v5 = vpop.permute.xlu1 %250 }
 0x3f2   :  { %v257_v6 = vsel %vm252_vm5, %v251_v5, 0 }
 0x3f3   :  { %3210 = vmatpush3.bf16.xpose.msra.mxu1 %v257_v6 }
 0x3f4   :  { %3221 = vmatprep.subr.bf16.mxu1 %v3678_v3 }
 0x3f5   :  { %v301_v7 = vpop.permute.xlu1 %300 }
 0x3f6   :  { %v306_v8 = vsel %vm252_vm5, %v301_v7, 0 }
 0x3f7   :  { %3216 = vmatpush3.bf16.xpose.msra.mxu0 %v306_v8 }
 0x3f8   :  { %3227 = vmatprep.subr.bf16.mxu0 %v3678_v3 }
 0x3fa   :  { %3212 = vmatmul.mubr.msk.bf16.vlgmr.msra.gmra.mrb[8].mxu1 %vm252_vm5, %v3875_v63 }
 0x3fb   :  { %3223 = vmatprep.mubr.msk.bf16.mxu1 %vm3679_vm0, %v3678_v3 }
 0x3fe   :  { %3218 = vmatmul.mubr.msk.bf16.vlgmr.msra.gmra.mrb[0].mxu0 %vm252_vm5, %v3879_v4 }
 0x3ff   :  { %3229 = vmatprep.mubr.msk.bf16.mxu0 %vm3679_vm0, %v3678_v3 }
 0x4cd   :  { %v293_v11 = vpop.f32.mrb[8].mxu1 }
 0x4ce   :  { %v348_v12 = vmul.f32 0.35355338, %v293_v11  ;;  %v3213_v13 = vpop.f32.mrb[9].mxu1 }
 0x4cf   :  { %v296_v14 = vpop.f32.mrb[10].mxu1 }
 0x4d0   :  { %v3214_v15 = vpop.f32.mrb[11].mxu1  ;;  %v352_v18 = vsel %vm3897_vm6, %v348_v12, -1e+30 }
 0x4d1   :  { %v342_v19 = vpop.f32.mrb[0].mxu0  ;;  %v354_v20 = vsel %vm252_vm5, %v352_v18, -inf }
 0x4d2   :  { %v349_v21 = vmul.f32 0.35355338, %v342_v19  ;;  %v3219_v22 = vpop.f32.mrb[1].mxu0  ;;  %355 = vmax.xlane.f32.xlu1 %v354_v20 }
 0x4d3   :  { %v345_v16 = vpop.f32.mrb[2].mxu0 }
 0x4d4   :  { %v3220_v23 = vpop.f32.mrb[3].mxu0  ;;  %v353_v17 = vsel %vm3897_vm6, %v349_v21, -1e+30 }
 0x4d5   :  { %v357_v24 = vsel %vm252_vm5, %v353_v17, -inf }
 0x4d6   :  { %358 = vmax.xlane.f32.xlu0 %v357_v24 }
 0x4e3   :  { %427 = vrot.lane.b32.xlu1 %v3879_v4, %s3681_s29 }
 0x4ec   :  { %378 = vrot.lane.b32.xlu0 %v3875_v63, %s3681_s29 }
 0x4f0   :  { %477 = vrot.lane.b32.xlu0 %v3875_v63, %s3682_s19 }
 0x55f   :  { %v356_v25 = vpop.xlane.xlu1 %355 }
 0x560   :  { %v360_v27 = vsub.f32 %v352_v18, %v356_v25 }
 0x562   :  { %v362_v28 = vmul.f32 1.442695, %v360_v27 }
 0x563   :  { %v359_v30 = vpop.xlane.xlu0 %358  ;;  %v428_v31 = vpop.permute.xlu1 %427 }
 0x564   :  { %3573 = vpow2.f32 %v362_v28  ;;  %v361_v32 = vsub.f32 %v353_v17, %v359_v30  ;;  %v433_v33 = vsel %vm383_vm7, %v428_v31, 0 }
 0x565   :  { %3228 = vmatpush3.bf16.msra.mxu0 %v433_v33 }
 0x566   :  { %v364_v34 = vmul.f32 1.442695, %v361_v32  ;;  %3239 = vmatprep.subr.bf16.mxu0 %v3678_v3 }
 0x567   :  { %v379_v35 = vpop.permute.xlu0 %378 }
 0x568   :  { %3575 = vpow2.f32 %v364_v34  ;;  %v385_v36 = vsel %vm383_vm7, %v379_v35, 0 }
 0x569   :  { %3222 = vmatpush3.bf16.msra.mxu1 %v385_v36 }
 0x56a   :  { %3233 = vmatprep.subr.bf16.mxu1 %v3678_v3 }
 0x56b   :  { %v478_v41 = vpop.permute.xlu0 %477 }
 0x56c   :  { %v483_v49 = vsel %vm252_vm5, %v478_v41, 0 }
 0x56e   :  { %v3574_v37 = vpop.eup %3573 }
 0x56f   :  { %v366_v38 = vsel %vm252_vm5, %v3574_v37, 0.0 }
 0x570   :  { %367 = vadd.xlane.f32.xlu0 %v366_v38 }
 0x572   :  { %v3576_v39 = vpop.eup %3575 }
 0x573   :  { %v369_v40 = vsel %vm252_vm5, %v3576_v39, 0.0 }
 0x574   :  { %370 = vadd.xlane.f32.xlu0 %v369_v40 }
 0x58a   :  { %527 = vrot.lane.b32.xlu0 %v3879_v4, %s3682_s19 }
 0x58e   :  { %475 = vrot.lane.b32.xlu0 %v3875_v63, %s3683_s13 }
 0x592   :  { %525 = vrot.lane.b32.xlu0 %v3879_v4, %s3683_s13 }
 0x5fd   :  { %v368_v42 = vpop.xlane.xlu0 %367 }
 0x5fe   :  { %3577 = vrcp.f32 %v368_v42 }
 0x601   :  { %v371_v43 = vpop.xlane.xlu0 %370 }
 0x602   :  { %3579 = vrcp.f32 %v371_v43 }
 0x605   :  { %v528_v48 = vpop.permute.xlu0 %527 }
 0x606   :  { %v533_v52 = vsel %vm252_vm5, %v528_v48, 0 }
 0x608   :  { %v3578_v44 = vpop.eup %3577 }
 0x609   :  { %v374_v45 = vmul.f32 %v3578_v44, %v3574_v37  ;;  %v476_v53 = vpop.permute.xlu0 %475 }
 0x60b   :  { %v376_v46 = vpack.c.bf16 %v374_v45, %v374_v45 }
 0x60c   :  { %v3580_v47 = vpop.eup %3579 }
 0x60d   :  { %v375_v50 = vmul.f32 %v3580_v47, %v3576_v39  ;;  %3224 = vmatmul.mubr.msk.bf16.vlgmr.msra.gmra.mrb[12].mxu1 %vm252_vm5, %v376_v46  ;;  %v526_v54 = vpop.permute.xlu0 %525 }
 0x60e   :  { %3234 = vmatpush3.bf16.xpose.msra.mxu1 %v483_v49  ;;  %3235 = vmatprep.mubr.msk.bf16.mxu1 %vm3679_vm0, %v3678_v3 }
 0x60f   :  { %v377_v51 = vpack.c.bf16 %v375_v50, %v375_v50  ;;  %3245 = vmatprep.subr.bf16.mxu1 %v3678_v3 }
 0x611   :  { %3230 = vmatmul.mubr.msk.bf16.vlgmr.msra.gmra.mrb[4].mxu0 %vm252_vm5, %v377_v51 }
 0x612   :  { %3240 = vmatpush3.bf16.xpose.msra.mxu0 %v533_v52  ;;  %3241 = vmatprep.mubr.msk.bf16.mxu0 %vm3679_vm0, %v3678_v3 }
 0x613   :  { %3251 = vmatprep.subr.bf16.mxu0 %v3678_v3 }
 0x615   :  { %3236 = vmatmul.mubr.msk.bf16.vlgmr.msra.gmra.mrb[16].mxu1 %vm252_vm5, %v476_v53 }
 0x616   :  { %3247 = vmatprep.mubr.msk.bf16.mxu1 %vm3679_vm0, %v3678_v3 }
 0x619   :  { %3242 = vmatmul.mubr.msk.bf16.vlgmr.msra.gmra.mrb[8].mxu0 %vm252_vm5, %v526_v54 }
 0x61a   :  { %3253 = vmatprep.mubr.msk.bf16.mxu0 %vm3679_vm0, %v3678_v3 }
 0x6e0   :  { %v3941_v55 = vpop.f32.mrb[12].mxu1 }
 0x6e1   :  { %v3225_v56 = vpop.f32.mrb[13].mxu1 }
 0x6e2   :  { %v424_v57 = vpop.f32.mrb[14].mxu1 }
 0x6e3   :  { %v3226_v58 = vpop.f32.mrb[15].mxu1 }
 0x6e4   :  { %v3943_v59 = vpop.f32.mrb[4].mxu0 }
 0x6e5   :  { %v3231_v60 = vpop.f32.mrb[5].mxu0 }
 0x6e6   :  { %v472_v61 = vpop.f32.mrb[6].mxu0 }
 0x6e7   :  { %v3232_v62 = vpop.f32.mrb[7].mxu0 }
 0x6e8   :  { %v519_v0 = vpop.f32.mrb[16].mxu1 }
 0x6e9   :  { %v575_v1 = vmul.f32 0.35355338, %v519_v0  ;;  %v3237_v2 = vpop.f32.mrb[17].mxu1 }
 0x6ea   :  { %v522_v5 = vpop.f32.mrb[18].mxu1 }
 0x6eb   :  { %v3238_v6 = vpop.f32.mrb[19].mxu1  ;;  %v577_v7 = vsel %vm3897_vm6, %v575_v1, -1e+30 }
 0x6ec   :  { %v569_v8 = vpop.f32.mrb[8].mxu0  ;;  %v579_v9 = vsel %vm252_vm5, %v577_v7, -inf }
 0x6ed   :  { %v576_v11 = vmul.f32 0.35355338, %v569_v8  ;;  %v3243_v12 = vpop.f32.mrb[9].mxu0  ;;  %580 = vmax.xlane.f32.xlu1 %v579_v9 }
 0x6ee   :  { %v572_v13 = vpop.f32.mrb[10].mxu0 }
 0x6ef   :  { %v3244_v14 = vpop.f32.mrb[11].mxu0  ;;  %v578_v15 = vsel %vm3897_vm6, %v576_v11, -1e+30 }
 0x6f0   :  { %v582_v18 = vsel %vm252_vm5, %v578_v15, -inf }
 0x6f1   :  { %583 = vmax.xlane.f32.xlu0 %v582_v18 }
 0x6fe   :  { %651 = vrot.lane.b32.xlu1 %v3879_v4, %s3684_s1 }
 0x707   :  { %603 = vrot.lane.b32.xlu0 %v3875_v63, %s3684_s1 }
 0x77a   :  { %v581_v19 = vpop.xlane.xlu1 %580 }
 0x77b   :  { %v585_v20 = vsub.f32 %v577_v7, %v581_v19 }
 0x77d   :  { %v587_v21 = vmul.f32 1.442695, %v585_v20 }
 0x77e   :  { %v584_v22 = vpop.xlane.xlu0 %583  ;;  %v652_v16 = vpop.permute.xlu1 %651 }
 0x77f   :  { %3581 = vpow2.f32 %v587_v21  ;;  %v586_v23 = vsub.f32 %v578_v15, %v584_v22  ;;  %v657_v17 = vsel %vm383_vm7, %v652_v16, 0 }
 0x780   :  { %3252 = vmatpush3.bf16.msra.mxu0 %v657_v17 }
 0x781   :  { %v589_v24 = vmul.f32 1.442695, %v586_v23  ;;  %3263 = vmatprep.subr.bf16.mxu0 %v3678_v3 }
 0x782   :  { %v604_v25 = vpop.permute.xlu0 %603 }
 0x783   :  { %3583 = vpow2.f32 %v589_v24  ;;  %v609_v27 = vsel %vm383_vm7, %v604_v25, 0 }
 0x784   :  { %3246 = vmatpush3.bf16.msra.mxu1 %v609_v27 }
 0x785   :  { %3257 = vmatprep.subr.bf16.mxu1 %v3678_v3 }
 0x789   :  { %v3582_v28 = vpop.eup %3581 }
 0x78a   :  { %v591_v30 = vsel %vm252_vm5, %v3582_v28, 0.0 }
 0x78b   :  { %592 = vadd.xlane.f32.xlu0 %v591_v30 }
 0x78d   :  { %v3584_v31 = vpop.eup %3583 }
 0x78e   :  { %v594_v32 = vsel %vm252_vm5, %v3584_v31, 0.0 }
 0x78f   :  { %595 = vadd.xlane.f32.xlu1 %v594_v32 }
 0x7a0   :  { %701 = vrot.lane.b32.xlu1 %v3875_v63, %s3685_s20 }
 0x7a1   :  { %751 = vrot.lane.b32.xlu0 %v3879_v4, %s3685_s20 }
 0x7a4   :  { %699 = vrot.lane.b32.xlu1 %v3875_v63, %s3686_s21 }
 0x7a5   :  { %749 = vrot.lane.b32.xlu0 %v3879_v4, %s3686_s21 }
 0x818   :  { %v593_v33 = vpop.xlane.xlu0 %592 }
 0x819   :  { %3585 = vrcp.f32 %v593_v33 }
 0x81c   :  { %v596_v34 = vpop.xlane.xlu1 %595  ;;  %v752_v42 = vpop.permute.xlu0 %751 }
 0x81d   :  { %3587 = vrcp.f32 %v596_v34  ;;  %v757_v44 = vsel %vm252_vm5, %v752_v42, 0 }
 0x820   :  { %v702_v37 = vpop.permute.xlu1 %701  ;;  %v750_v46 = vpop.permute.xlu0 %749 }
 0x821   :  { %v707_v41 = vsel %vm252_vm5, %v702_v37, 0 }
 0x823   :  { %v3586_v35 = vpop.eup %3585 }
 0x824   :  { %v599_v36 = vmul.f32 %v3586_v35, %v3582_v28  ;;  %v700_v45 = vpop.permute.xlu1 %699 }
 0x826   :  { %v601_v38 = vpack.c.bf16 %v599_v36, %v599_v36 }
 0x827   :  { %v3588_v39 = vpop.eup %3587 }
 0x828   :  { %v600_v40 = vmul.f32 %v3588_v39, %v3584_v31  ;;  %3248 = vmatmul.mubr.msk.bf16.vlgmr.msra.gmra.mrb[20].mxu1 %vm252_vm5, %v601_v38 }
 0x829   :  { %3258 = vmatpush3.bf16.xpose.msra.mxu1 %v707_v41  ;;  %3259 = vmatprep.mubr.msk.bf16.mxu1 %vm3679_vm0, %v3678_v3 }
 0x82a   :  { %v602_v43 = vpack.c.bf16 %v600_v40, %v600_v40  ;;  %3269 = vmatprep.subr.bf16.mxu1 %v3678_v3 }
 0x82c   :  { %3254 = vmatmul.mubr.msk.bf16.vlgmr.msra.gmra.mrb[12].mxu0 %vm252_vm5, %v602_v43 }
 0x82d   :  { %3264 = vmatpush3.bf16.xpose.msra.mxu0 %v757_v44  ;;  %3265 = vmatprep.mubr.msk.bf16.mxu0 %vm3679_vm0, %v3678_v3 }
 0x82e   :  { %3275 = vmatprep.subr.bf16.mxu0 %v3678_v3 }
 0x830   :  { %3260 = vmatmul.mubr.msk.bf16.vlgmr.msra.gmra.mrb[24].mxu1 %vm252_vm5, %v700_v45 }
 0x831   :  { %3271 = vmatprep.mubr.msk.bf16.mxu1 %vm3679_vm0, %v3678_v3 }
 0x834   :  { %3266 = vmatmul.mubr.msk.bf16.vlgmr.msra.gmra.mrb[16].mxu0 %vm252_vm5, %v750_v46 }
 0x835   :  { %3277 = vmatprep.mubr.msk.bf16.mxu0 %vm3679_vm0, %v3678_v3 }
 0x8fb   :  { %v3985_v47 = vpop.f32.mrb[20].mxu1 }
 0x8fc   :  { %v3249_v48 = vpop.f32.mrb[21].mxu1 }
 0x8fd   :  { %v648_v49 = vpop.f32.mrb[22].mxu1 }
 0x8fe   :  { %v3250_v50 = vpop.f32.mrb[23].mxu1 }
 0x8ff   :  { %v3987_v51 = vpop.f32.mrb[12].mxu0 }
 0x900   :  { %v3509_v52 = vpack.i.bf16 %v3987_v51, %v3985_v47  ;;  %v3255_v53 = vpop.f32.mrb[13].mxu0 }
 0x901   :  { %v696_v54 = vpop.f32.mrb[14].mxu0 }
 0x902   :  { %v3256_v56 = vpop.f32.mrb[15].mxu0 }
 0x903   :  { %v743_v57 = vpop.f32.mrb[24].mxu1 }
 0x904   :  { %v799_v58 = vmul.f32 0.35355338, %v743_v57  ;;  %v3261_v60 = vpop.f32.mrb[25].mxu1 }
 0x905   :  { %v746_v61 = vpop.f32.mrb[26].mxu1 }
 0x906   :  { %v3262_v62 = vpop.f32.mrb[27].mxu1  ;;  %v801_v0 = vsel %vm3897_vm6, %v799_v58, -1e+30 }
 0x907   :  { %v793_v1 = vpop.f32.mrb[16].mxu0  ;;  %v803_v2 = vsel %vm252_vm5, %v801_v0, -inf }
 0x908   :  { %v800_v5 = vmul.f32 0.35355338, %v793_v1  ;;  %v3267_v6 = vpop.f32.mrb[17].mxu0  ;;  %804 = vmax.xlane.f32.xlu1 %v803_v2 }
 0x909   :  { %v796_v7 = vpop.f32.mrb[18].mxu0 }
 0x90a   :  { %v3268_v8 = vpop.f32.mrb[19].mxu0  ;;  %v802_v9 = vsel %vm3897_vm6, %v800_v5, -1e+30 }
 0x90b   :  { %v806_v11 = vsel %vm252_vm5, %v802_v9, -inf }
 0x90c   :  { %807 = vmax.xlane.f32.xlu0 %v806_v11 }
 0x919   :  { %875 = vrot.lane.b32.xlu1 %v3879_v4, %s3687_s22 }
 0x922   :  { %827 = vrot.lane.b32.xlu0 %v3875_v63, %s3687_s22 }
 0x995   :  { %v805_v12 = vpop.xlane.xlu1 %804 }
 0x996   :  { %v809_v13 = vsub.f32 %v801_v0, %v805_v12 }
 0x998   :  { %v811_v14 = vmul.f32 1.442695, %v809_v13 }
 0x999   :  { %v808_v15 = vpop.xlane.xlu0 %807  ;;  %v876_v18 = vpop.permute.xlu1 %875 }
 0x99a   :  { %3589 = vpow2.f32 %v811_v14  ;;  %v810_v19 = vsub.f32 %v802_v9, %v808_v15  ;;  %v881_v20 = vsel %vm383_vm7, %v876_v18, 0 }
 0x99b   :  { %3276 = vmatpush3.bf16.msra.mxu0 %v881_v20 }
 0x99c   :  { %v813_v21 = vmul.f32 1.442695, %v810_v19  ;;  %3287 = vmatprep.subr.bf16.mxu0 %v3678_v3 }
 0x99d   :  { %v828_v22 = vpop.permute.xlu0 %827 }
 0x99e   :  { %3591 = vpow2.f32 %v813_v21  ;;  %v833_v16 = vsel %vm383_vm7, %v828_v22, 0 }
 0x99f   :  { %3270 = vmatpush3.bf16.msra.mxu1 %v833_v16 }
 0x9a0   :  { %3281 = vmatprep.subr.bf16.mxu1 %v3678_v3 }
 0x9a4   :  { %v3590_v23 = vpop.eup %3589 }
 0x9a5   :  { %v815_v17 = vsel %vm252_vm5, %v3590_v23, 0.0 }
 0x9a6   :  { %816 = vadd.xlane.f32.xlu0 %v815_v17 }
 0x9a8   :  { %v3592_v24 = vpop.eup %3591 }
 0x9a9   :  { %v818_v25 = vsel %vm252_vm5, %v3592_v24, 0.0 }
 0x9aa   :  { %819 = vadd.xlane.f32.xlu1 %v818_v25 }
 0x9bb   :  { %925 = vrot.lane.b32.xlu1 %v3875_v63, %s4518_s2 }
 0x9bc   :  { %975 = vrot.lane.b32.xlu0 %v3879_v4, %s4518_s2 }
 0x9bf   :  { %923 = vrot.lane.b32.xlu1 %v3875_v63, %s4516_s23 }
 0x9c0   :  { %973 = vrot.lane.b32.xlu0 %v3879_v4, %s4516_s23 }
 0xa33   :  { %v817_v27 = vpop.xlane.xlu0 %816 }
 0xa34   :  { %3593 = vrcp.f32 %v817_v27 }
 0xa37   :  { %v820_v28 = vpop.xlane.xlu1 %819  ;;  %v976_v37 = vpop.permute.xlu0 %975 }
 0xa38   :  { %3595 = vrcp.f32 %v820_v28  ;;  %v981_v39 = vsel %vm252_vm5, %v976_v37, 0  ;;  %v3541_v28 = vld [vmem:[%s4493_s6] sm:$0xff]  }
 0xa3b   :  { %v926_v32 = vpop.permute.xlu1 %925  ;;  %v974_v41 = vpop.permute.xlu0 %973 }
 0xa3c   :  { %v931_v36 = vsel %vm252_vm5, %v926_v32, 0 }
 0xa3e   :  { %v3594_v30 = vpop.eup %3593 }
 0xa3f   :  { %v823_v31 = vmul.f32 %v3594_v30, %v3590_v23  ;;  %v924_v40 = vpop.permute.xlu1 %923  ;;  %v3542_v30 = vld [vmem:[%s4493_s6 + $0x8] sm:$0xff]  }
 0xa41   :  { %v825_v33 = vpack.c.bf16 %v823_v31, %v823_v31 }
 0xa42   :  { %v3596_v34 = vpop.eup %3595 }
 0xa43   :  { %v824_v35 = vmul.f32 %v3596_v34, %v3592_v24  ;;  %3272 = vmatmul.mubr.msk.bf16.vlgmr.msra.gmra.mrb[28].mxu1 %vm252_vm5, %v825_v33 }
 0xa44   :  { %3282 = vmatpush3.bf16.xpose.msra.mxu1 %v931_v36  ;;  %3283 = vmatprep.mubr.msk.bf16.mxu1 %vm3679_vm0, %v3678_v3 }
 0xa45   :  { %v826_v38 = vpack.c.bf16 %v824_v35, %v824_v35  ;;  %3293 = vmatprep.subr.bf16.mxu1 %v3678_v3 }
 0xa47   :  { %3278 = vmatmul.mubr.msk.bf16.vlgmr.msra.gmra.mrb[20].mxu0 %vm252_vm5, %v826_v38 }
 0xa48   :  { %3288 = vmatpush3.bf16.xpose.msra.mxu0 %v981_v39  ;;  %3289 = vmatprep.mubr.msk.bf16.mxu0 %vm3679_vm0, %v3678_v3 }
 0xa49   :  { %3299 = vmatprep.subr.bf16.mxu0 %v3678_v3 }
 0xa4b   :  { %3284 = vmatmul.mubr.msk.bf16.vlgmr.msra.gmra.mrb[32].mxu1 %vm252_vm5, %v924_v40 }
 0xa4c   :  { %3295 = vmatprep.mubr.msk.bf16.mxu1 %vm3679_vm0, %v3678_v3 }
 0xa4f   :  { %3290 = vmatmul.mubr.msk.bf16.vlgmr.msra.gmra.mrb[24].mxu0 %vm252_vm5, %v974_v41 }
 0xa50   :  { %3301 = vmatprep.mubr.msk.bf16.mxu0 %vm3679_vm0, %v3678_v3 }
 0xb16   :  { %v869_v42 = vpop.f32.mrb[28].mxu1 }
 0xb17   :  { %v3273_v43 = vpop.f32.mrb[29].mxu1 }
 0xb18   :  { %v872_v44 = vpop.f32.mrb[30].mxu1 }
 0xb19   :  { %v3274_v45 = vpop.f32.mrb[31].mxu1 }
 0xb1a   :  { %v917_v46 = vpop.f32.mrb[20].mxu0 }
 0xb1b   :  { %v3514_v48 = vpack.i.bf16 %v917_v46, %v869_v42  ;;  %v3279_v49 = vpop.f32.mrb[21].mxu0 }
 0xb1c   :  { %v920_v50 = vpop.f32.mrb[22].mxu0 }
 0xb1d   :  { %v3280_v53 = vpop.f32.mrb[23].mxu0 }
 0xb1e   :  { %v967_v54 = vpop.f32.mrb[32].mxu1 }
 0xb1f   :  { %v1023_v56 = vmul.f32 0.35355338, %v967_v54  ;;  %v3285_v57 = vpop.f32.mrb[33].mxu1 }
 0xb20   :  { %v970_v58 = vpop.f32.mrb[34].mxu1 }
 0xb21   :  { %v3286_v60 = vpop.f32.mrb[35].mxu1  ;;  %v1025_v61 = vsel %vm3897_vm6, %v1023_v56, -1e+30 }
 0xb22   :  { %v1017_v62 = vpop.f32.mrb[24].mxu0  ;;  %v1027_v0 = vsel %vm252_vm5, %v1025_v61, -inf }
 0xb23   :  { %v1024_v1 = vmul.f32 0.35355338, %v1017_v62  ;;  %v3291_v2 = vpop.f32.mrb[25].mxu0  ;;  %1028 = vmax.xlane.f32.xlu1 %v1027_v0 }
 0xb24   :  { %v1020_v5 = vpop.f32.mrb[26].mxu0 }
 0xb25   :  { %v3292_v6 = vpop.f32.mrb[27].mxu0  ;;  %v1026_v7 = vsel %vm3897_vm6, %v1024_v1, -1e+30 }
 0xb26   :  { %v1030_v8 = vsel %vm252_vm5, %v1026_v7, -inf }
 0xb27   :  { %1031 = vmax.xlane.f32.xlu0 %v1030_v8 }
 0xbb0   :  { %v1029_v9 = vpop.xlane.xlu1 %1028 }
 0xbb1   :  { %v1033_v11 = vsub.f32 %v1025_v61, %v1029_v9 }
 0xbb3   :  { %v1035_v12 = vmul.f32 1.442695, %v1033_v11 }
 0xbb4   :  { %v1032_v13 = vpop.xlane.xlu0 %1031 }
 0xbb5   :  { %3597 = vpow2.f32 %v1035_v12  ;;  %v1034_v14 = vsub.f32 %v1026_v7, %v1032_v13 }
 0xbb7   :  { %v1037_v15 = vmul.f32 1.442695, %v1034_v14 }
 0xbb9   :  { %3599 = vpow2.f32 %v1037_v15 }
 0xbbf   :  { %v3598_v18 = vpop.eup %3597 }
 0xbc0   :  { %v1039_v19 = vsel %vm252_vm5, %v3598_v18, 0.0 }
 0xbc1   :  { %1040 = vadd.xlane.f32.xlu0 %v1039_v19 }
 0xbc3   :  { %v3600_v20 = vpop.eup %3599 }
 0xbc4   :  { %v1042_v21 = vsel %vm252_vm5, %v3600_v20, 0.0 }
 0xbc5   :  { %1043 = vadd.xlane.f32.xlu1 %v1042_v21  ;;  %v3544_v21 = vld [vmem:[%s4497_s10 + $0x8] sm:$0xff]  }
 0xbd6   :  { %1099 = vrot.lane.b32.xlu1 %v3879_v4, %s4514_s24 }
 0xbd7   :  { %1051 = vrot.lane.b32.xlu0 %v3875_v63, %s4514_s24  ;;  %s4529_s24 = sld [smem:[#allocation8_spill]] }
 0xbda   :  { %3510 = vrot.lane.b32.xlu1 %v3509_v52, %s4512_s25 }
 0xbdb   :  { %3515 = vrot.lane.b32.xlu0 %v3514_v48, %s4510_s26 }
 0xc4e   :  { %v1041_v22 = vpop.xlane.xlu0 %1040 }
 0xc4f   :  { %3601 = vrcp.f32 %v1041_v22  ;;  %v3545_v22 = vld [vmem:[%s4499_s12] sm:$0xff]  }
 0xc52   :  { %v1052_v16 = vpop.permute.xlu0 %1051  ;;  %v1044_v23 = vpop.xlane.xlu1 %1043 }
 0xc53   :  { %v1057_v17 = vsel %vm383_vm7, %v1052_v16, 0  ;;  %3603 = vrcp.f32 %v1044_v23  ;;  %v3546_v16 = vld [vmem:[%s4499_s12 + $0x8] sm:$0xff]   ;;  %v3547_v23 = vld [vmem:[%s4499_s12 + $0x10] sm:$0xff]  }
 0xc54   :  { %3294 = vmatpush3.bf16.msra.mxu1 %v1057_v17  ;;  %v3548_v17 = vld [vmem:[%s4499_s12 + $0x18] sm:$0xff]  }
 0xc55   :  { %3305 = vmatprep.subr.bf16.mxu1 %v3678_v3 }
 0xc56   :  { %v1100_v63 = vpop.permute.xlu1 %1099  ;;  %v3516_v43 = vpop.permute.xlu0 %3515 }
 0xc57   :  { %v1105_v4 = vsel %vm383_vm7, %v1100_v63, 0  ;;  %v3518_v46 = vunpack.i.h.bf16 %v3516_v43  ;;  %v3517_v48 = vunpack.i.l.bf16 %v3516_v43  ;;  %v3549_v63 = vld [vmem:[%s4499_s12 + $0x20] sm:$0xff]  }
 0xc58   :  { %3300 = vmatpush3.bf16.msra.mxu0 %v1105_v4  ;;  %v3550_v4 = vld [vmem:[%s4499_s12 + $0x28] sm:$0xff]  }
 0xc59   :  { %v3602_v24 = vpop.eup %3601  ;;  %3313 = vmatprep.subr.bf16.mxu0 %v3678_v3 }
 0xc5a   :  { %v1047_v47 = vmul.f32 %v3602_v24, %v3598_v18  ;;  %v3511_v40 = vpop.permute.xlu1 %3510 }
 0xc5b   :  { %v3513_v41 = vunpack.i.h.bf16 %v3511_v40  ;;  %v3512_v42 = vunpack.i.l.bf16 %v3511_v40  ;;  %v3551_v40 = vld [vmem:[%s4499_s12 + $0x30] sm:$0xff]  }
 0xc5c   :  { %v1049_v51 = vpack.c.bf16 %v1047_v47, %v1047_v47 }
 0xc5d   :  { %v3604_v52 = vpop.eup %3603  ;;  %v1172_v44 = vsel %vm252_vm5, %v3943_v59, %v3513_v41  ;;  %v1171_v45 = vsel %vm252_vm5, %v3941_v55, %v3512_v42  ;;  %v2984_v59 = vld [vmem:[%s4494_s7] ss:$0 sm:$0xff]  ;;  %v3552_v41 = vld [vmem:[%s4499_s12 + $0x38] sm:$0xff]  }
 0xc5e   :  { %v1048_v25 = vmul.f32 %v3604_v52, %v3600_v20  ;;  %3296 = vmatmul.mubr.msk.bf16.vlgmr.msra.gmra.mrb[36].mxu1 %vm252_vm5, %v1049_v51  ;;  %v1174_v54 = vsel %vm1173_vm8, %v1171_v45, %v3517_v48  ;;  %v1175_v56 = vsel %vm1173_vm8, %v1172_v44, %v3518_v46  ;;  %v3543_v20 = vld [vmem:[%s4497_s10] sm:$0xff]  }
 0xc5f   :  { %3309 = vmatprep.mubr.msk.bf16.mxu1 %vm3679_vm0, %v3678_v3  ;;  %3306 = vmatpush3.bf16.msra.mxu1 %v3541_v28  ;;  %v2987_v42 = vld [vmem:[%s4498_s11] ss:$0 sm:$0xff] }
 0xc60   :  { %v1050_v27 = vpack.c.bf16 %v1048_v25, %v1048_v25  ;;  %3307 = vmatprep.subr.bf16.mxu1 %v3678_v3 }
 0xc62   :  { %3302 = vmatmul.mubr.msk.bf16.vlgmr.msra.gmra.mrb[28].mxu0 %vm252_vm5, %v1050_v27 }
 0xc63   :  { %3317 = vmatprep.mubr.msk.bf16.mxu0 %vm3679_vm0, %v3678_v3  ;;  %3308 = vmatpush3.bf16.msra.mxu1 %v3542_v30 }
 0xc64   :  { %3321 = vmatprep.subr.bf16.mxu1 %v3678_v3  ;;  %3314 = vmatpush3.bf16.msra.mxu0 %v3543_v20 }
 0xc65   :  { %3315 = vmatprep.subr.bf16.mxu0 %v3678_v3 }
 0xc68   :  { %3316 = vmatpush3.bf16.msra.mxu0 %v3544_v21 }
 0xc69   :  { %3341 = vmatprep.subr.bf16.mxu0 %v3678_v3 }
 0xd31   :  { %v1093_v31 = vpop.f32.mrb[36].mxu1 }
 0xd32   :  { %v3297_v32 = vpop.f32.mrb[37].mxu1 }
 0xd33   :  { %v1096_v33 = vpop.f32.mrb[38].mxu1 }
 0xd34   :  { %v3298_v34 = vpop.f32.mrb[39].mxu1 }
 0xd35   :  { %v1141_v35 = vpop.f32.mrb[28].mxu0 }
 0xd36   :  { %v3519_v36 = vpack.i.bf16 %v1141_v35, %v1093_v31  ;;  %v3303_v37 = vpop.f32.mrb[29].mxu0  ;;  %v2985_v31 = vld [vmem:[%s4495_s8] ss:$0 sm:$0xff] }
 0xd37   :  { %v1144_v38 = vpop.f32.mrb[30].mxu0  ;;  %v2986_v35 = vld [vmem:[%s4496_s9] ss:$0 sm:$0xff] }
 0xd38   :  { %v3304_v39 = vpop.f32.mrb[31].mxu0  ;;  %3520 = vrot.lane.b32.xlu1 %v3519_v36, %s4511_s27 }
 0xdaa   :  { %v3521_v49 = vpop.permute.xlu1 %3520 }
 0xdab   :  { %v3523_v50 = vunpack.i.h.bf16 %v3521_v49  ;;  %v3522_v53 = vunpack.i.l.bf16 %v3521_v49 }
 0xdad   :  { %v1178_v57 = vsel %vm1176_vm9, %v1175_v56, %v3523_v50  ;;  %v1177_v58 = vsel %vm1176_vm9, %v1174_v54, %v3522_v53 }
 0xdae   :  { %v1179_v60 = vpack.c.bf16 %v1178_v57, %v1177_v58  ;;  %v2999_v57 = vld [vmem:[%s4529_s24] ss:$0 sm:$0xff] }
 0xdb0   :  { %3310 = vmatmul.mubr.msk.bf16.vlgmr.msra.gmra.mrb[40].mxu1 %vm142_vm4, %v1179_v60 }
 0xdb1   :  { %3337 = vmatprep.mubr.msk.bf16.mxu1 %vm3679_vm0, %v3678_v3  ;;  %3322 = vmatpush3.bf16.msra.mxu1 %v3545_v22 }
 0xdb2   :  { %3323 = vmatprep.subr.bf16.mxu1 %v3678_v3 }
 0xdb5   :  { %3324 = vmatpush3.bf16.msra.mxu1 %v3546_v16 }
 0xdb6   :  { %3325 = vmatprep.subr.bf16.mxu1 %v3678_v3 }
 0xdb9   :  { %3326 = vmatpush3.bf16.msra.mxu1 %v3547_v23 }
 0xdba   :  { %3327 = vmatprep.subr.bf16.mxu1 %v3678_v3 }
 0xdbd   :  { %3328 = vmatpush3.bf16.msra.mxu1 %v3548_v17  ;;  %v3002_v17 = vld [vmem:[%s4490_s3 + $0x1] ss:$0 sm:$0xff]  ;;  %s4530_s3 = smov 72  }
 0xdbe   :  { %3329 = vmatprep.subr.bf16.mxu1 %v3678_v3 }
 0xdc1   :  { %3330 = vmatpush3.bf16.msra.mxu1 %v3549_v63 }
 0xdc2   :  { %3331 = vmatprep.subr.bf16.mxu1 %v3678_v3 }
 0xdc5   :  { %3332 = vmatpush3.bf16.msra.mxu1 %v3550_v4 }
 0xdc6   :  { %3333 = vmatprep.subr.bf16.mxu1 %v3678_v3 }
 0xdc9   :  { %3334 = vmatpush3.bf16.msra.mxu1 %v3551_v40 }
 0xdca   :  { %3335 = vmatprep.subr.bf16.mxu1 %v3678_v3 }
 0xdcd   :  { %3336 = vmatpush3.bf16.msra.mxu1 %v3552_v41 }
 0xdce   :  { %3367 = vmatprep.subr.bf16.mxu1 %v3678_v3 }
 0xe83   :  { %v1233_v55 = vpop.f32.mrb[40].mxu1 }
 0xe84   :  { %v1240_v61 = vadd.f32 %v1233_v55, %v3846_v26  ;;  %v3311_v62 = vpop.f32.mrb[41].mxu1 }
 0xe85   :  { %v1236_v0 = vpop.f32.mrb[42].mxu1 }
 0xe86   :  { %v4082_v1 = vadd.f32 %v2984_v59, %v1240_v61  ;;  %v1241_v2 = vadd.f32 %v1236_v0, %v3848_v29  ;;  %v3312_v5 = vpop.f32.mrb[43].mxu1 }
 0xe88   :  { %v4085_v6 = vadd.f32 %v2984_v59, %v1241_v2  ;;  %v1253_v7 = vsel %vm142_vm4, %v4082_v1, 0.0 }
 0xe89   :  { %1254 = vadd.xlane.f32.xlu0 %v1253_v7 }
 0xe8a   :  { %v1256_v8 = vsel %vm142_vm4, %v4085_v6, 0.0 }
 0xe8b   :  { %1257 = vadd.xlane.f32.xlu1 %v1256_v8 }
 0xf16   :  { %v1255_v9 = vpop.xlane.xlu0 %1254 }
 0xf17   :  { %v1259_v11 = vmul.f32 0.03125, %v1255_v9 }
 0xf18   :  { %v1258_v26 = vpop.xlane.xlu1 %1257 }
 0xf19   :  { %v1261_v12 = vsub.f32 %v4082_v1, %v1259_v11  ;;  %v1260_v13 = vmul.f32 0.03125, %v1258_v26 }
 0xf1b   :  { %v1262_v14 = vsub.f32 %v4085_v6, %v1260_v13  ;;  %v1263_v29 = vmul.f32 %v1261_v12, %v1261_v12 }
 0xf1d   :  { %v1265_v15 = vsel %vm142_vm4, %v1263_v29, 0.0  ;;  %v1264_v18 = vmul.f32 %v1262_v14, %v1262_v14  ;;  %v3553_v29 = vld [vmem:[%s4492_s5 + $0x10] sm:$0xff]  }
 0xf1e   :  { %1266 = vadd.xlane.f32.xlu0 %v1265_v15  ;;  %v3554_v15 = vld [vmem:[%s4492_s5 + $0x18] sm:$0xff]  }
 0xf1f   :  { %v1268_v19 = vsel %vm142_vm4, %v1264_v18, 0.0 }
 0xf22   :  { %1269 = vadd.xlane.f32.xlu0 %v1268_v19 }
 0xfab   :  { %v1267_v24 = vpop.xlane.xlu0 %1266 }
 0xfac   :  { %v1271_v47 = vmul.f32 0.03125, %v1267_v24 }
 0xfae   :  { %v1273_v51 = vadd.f32 1e-05, %v1271_v47 }
 0xfaf   :  { %v1270_v52 = vpop.xlane.xlu0 %1269 }
 0xfb0   :  { %3605 = vrsqrt.f32 %v1273_v51  ;;  %v1272_v25 = vmul.f32 0.03125, %v1270_v52  ;;  %v3003_v51 = vld [vmem:[%s4491_s4 + $0x1] ss:$0 sm:$0xff]  ;;  %s4531_s4 = smov 104  }
 0xfb2   :  { %v1274_v27 = vadd.f32 1e-05, %v1272_v25 }
 0xfb4   :  { %3607 = vrsqrt.f32 %v1274_v27 }
 0xfba   :  { %v3606_v28 = vpop.eup %3605 }
 0xfbb   :  { %v1277_v30 = vmul.f32 %v3606_v28, %v1261_v12 }
 0xfbd   :  { %v1285_v33 = vmul.f32 %v2985_v31, %v1277_v30 }
 0xfbe   :  { %v3608_v32 = vpop.eup %3607 }
 0xfbf   :  { %v1278_v34 = vmul.f32 %v3608_v32, %v1262_v14  ;;  %v1293_v37 = vadd.f32 %v2986_v35, %v1285_v33 }
 0xfc1   :  { %v1286_v36 = vmul.f32 %v2985_v31, %v1278_v34 }
 0xfc3   :  { %v1294_v38 = vadd.f32 %v2986_v35, %v1286_v36 }
 0xfc5   :  { %v1295_v39 = vpack.c.bf16 %v1294_v38, %v1293_v37 }
 0xfc7   :  { %3318 = vmatmul.mubr.msk.bf16.vlgmr.msra.gmra.mrb[32].mxu0 %vm142_vm4, %v1295_v39 }
 0xfc8   :  { %3345 = vmatprep.mubr.msk.bf16.mxu0 %vm3679_vm0, %v3678_v3  ;;  %3342 = vmatpush3.bf16.msra.mxu0 %v3553_v29 }
 0xfc9   :  { %3343 = vmatprep.subr.bf16.mxu0 %v3678_v3 }
 0xfcc   :  { %3344 = vmatpush3.bf16.msra.mxu0 %v3554_v15 }
 0xfcd   :  { %3349 = vmatprep.subr.bf16.mxu0 %v3678_v3 }
0x109a   :  { %v1356_v43 = vpop.f32.mrb[32].mxu0 }
0x109b   :  { %v1357_v44 = vadd.f32 %v2987_v42, %v1356_v43  ;;  %v3319_v45 = vpop.f32.mrb[33].mxu0 }
0x109c   :  { %v1359_v46 = vpop.f32.mrb[34].mxu0 }
0x109d   :  { %v1360_v48 = vadd.f32 %v2987_v42, %v1359_v46  ;;  %v3320_v49 = vpop.f32.mrb[35].mxu0  ;;  %v1363_v50 = vmax.f32 %v1357_v44, 0.0 }
0x109f   :  { %v1364_v53 = vmax.f32 %v1360_v48, 0.0 }
0x10a1   :  { %v1365_v54 = vpack.c.bf16 %v1364_v53, %v1363_v50 }
0x10a3   :  { %3338 = vmatmul.mubr.bf16.vlgmr.msra.gmra.mrb[44].mxu1 %v1365_v54 }
0x10a4   :  { %3369 = vmatprep.mubr.msk.bf16.mxu1 %vm3679_vm0, %v3678_v3 }
0x1176   :  { %v1464_v56 = vpop.f32.mrb[44].mxu1 }
0x1177   :  { %v1471_v58 = vadd.f32 %v1464_v56, %v4082_v1  ;;  %v3339_v60 = vpop.f32.mrb[45].mxu1 }
0x1178   :  { %v1467_v55 = vpop.f32.mrb[46].mxu1 }
0x1179   :  { %v4153_v59 = vadd.f32 %v2999_v57, %v1471_v58  ;;  %v1472_v61 = vadd.f32 %v1467_v55, %v4085_v6  ;;  %v3340_v62 = vpop.f32.mrb[47].mxu1 }
0x117b   :  { %v4156_v0 = vadd.f32 %v2999_v57, %v1472_v61  ;;  %v1486_v2 = vsel %vm142_vm4, %v4153_v59, 0.0 }
0x117c   :  { %1487 = vadd.xlane.f32.xlu1 %v1486_v2 }
0x117d   :  { %v1489_v5 = vsel %vm142_vm4, %v4156_v0, 0.0 }
0x117e   :  { %1490 = vadd.xlane.f32.xlu0 %v1489_v5 }
0x1209   :  { %v1488_v7 = vpop.xlane.xlu1 %1487 }
0x120a   :  { %v1492_v8 = vmul.f32 0.03125, %v1488_v7 }
0x120b   :  { %v1491_v1 = vpop.xlane.xlu0 %1490 }
0x120c   :  { %v1494_v9 = vsub.f32 %v4153_v59, %v1492_v8  ;;  %v1493_v11 = vmul.f32 0.03125, %v1491_v1 }
0x120e   :  { %v1495_v26 = vsub.f32 %v4156_v0, %v1493_v11  ;;  %v1496_v6 = vmul.f32 %v1494_v9, %v1494_v9 }
0x1210   :  { %v1498_v12 = vsel %vm142_vm4, %v1496_v6, 0.0  ;;  %v1497_v13 = vmul.f32 %v1495_v26, %v1495_v26 }
0x1211   :  { %1499 = vadd.xlane.f32.xlu1 %v1498_v12 }
0x1212   :  { %v1501_v14 = vsel %vm142_vm4, %v1497_v13, 0.0 }
0x1213   :  { %1502 = vadd.xlane.f32.xlu0 %v1501_v14 }
0x129e   :  { %v1500_v18 = vpop.xlane.xlu1 %1499 }
0x129f   :  { %v1504_v19 = vmul.f32 0.03125, %v1500_v18 }
0x12a0   :  { %v1503_v20 = vpop.xlane.xlu0 %1502 }
0x12a1   :  { %v1506_v21 = vadd.f32 1e-05, %v1504_v19  ;;  %v1505_v22 = vmul.f32 0.03125, %v1503_v20 }
0x12a3   :  { %3609 = vrsqrt.f32 %v1506_v21  ;;  %v1507_v16 = vadd.f32 1e-05, %v1505_v22 }
0x12a5   :  { %3611 = vrsqrt.f32 %v1507_v16 }
0x12ad   :  { %v3610_v23 = vpop.eup %3609 }
0x12ae   :  { %v1510_v63 = vmul.f32 %v3610_v23, %v1494_v9 }
0x12af   :  { %v3612_v4 = vpop.eup %3611 }
0x12b0   :  { %v1518_v24 = vmul.f32 %v3002_v17, %v1510_v63  ;;  %v1511_v47 = vmul.f32 %v3612_v4, %v1495_v26 }
0x12b2   :  { %v1519_v52 = vmul.f32 %v3002_v17, %v1511_v47  ;;  %v1526_v25 = vadd.f32 %v3003_v51, %v1518_v24 }
0x12b4   :  { %v1527_v27 = vadd.f32 %v3003_v51, %v1519_v52 }
0x12b6   :  { %v1528_v28 = vpack.c.bf16 %v1527_v27, %v1526_v25 }
0x12b8   :  { %3346 = vmatmul.mubr.msk.bf16.vlgmr.msra.gmra.mrb[36].mxu0 %vm142_vm4, %v1528_v28 }
0x12b9   :  { %3351 = vmatprep.mubr.msk.bf16.mxu0 %vm3679_vm0, %v3678_v3 }
0x138b   :  { %v1583_v30 = vpop.f32.mrb[36].mxu0 }
0x138c   :  { %v4183_v31 = vpack.c.bf16 %v1583_v30, %v1583_v30  ;;  %v3347_v32 = vpop.f32.mrb[37].mxu0 }
0x138d   :  { %v1586_v33 = vpop.f32.mrb[38].mxu0 }
0x138e   :  { %v4185_v34 = vpack.c.bf16 %v1586_v33, %v1586_v33  ;;  %1593 = vrot.lane.b32.xlu1 %v4183_v31, %s3680_s0  ;;  %v3348_v35 = vpop.f32.mrb[39].mxu0 }
0x1390   :  { %1642 = vrot.lane.b32.xlu0 %v4185_v34, %s3680_s0  ;;  %s4532_s0 = smov 40  }
0x1400   :  { %v1594_v36 = vpop.permute.xlu1 %1593 }
0x1401   :  { %v1599_v37 = vsel %vm252_vm5, %v1594_v36, 0 }
0x1402   :  { %3350 = vmatpush3.bf16.xpose.msra.mxu0 %v1599_v37  ;;  %v1643_v38 = vpop.permute.xlu0 %1642 }
0x1403   :  { %3355 = vmatprep.subr.bf16.mxu0 %v3678_v3  ;;  %v1648_v39 = vsel %vm252_vm5, %v1643_v38, 0 }
0x1409   :  { %3352 = vmatmul.mubr.msk.bf16.vlgmr.msra.gmra.mrb[40].mxu0 %vm252_vm5, %v4183_v31 }
0x140a   :  { %3356 = vmatpush3.bf16.xpose.msra.mxu0 %v1648_v39  ;;  %3357 = vmatprep.mubr.msk.bf16.mxu0 %vm3679_vm0, %v3678_v3 }
0x140b   :  { %3361 = vmatprep.subr.bf16.mxu0 %v3678_v3 }
0x1411   :  { %3358 = vmatmul.mubr.msk.bf16.vlgmr.msra.gmra.mrb[44].mxu0 %vm252_vm5, %v4185_v34 }
0x1412   :  { %3363 = vmatprep.mubr.msk.bf16.mxu0 %vm3679_vm0, %v3678_v3 }
0x14dc   :  { %v1635_v40 = vpop.f32.mrb[40].mxu0 }
0x14dd   :  { %v1690_v41 = vmul.f32 0.35355338, %v1635_v40  ;;  %v3353_v42 = vpop.f32.mrb[41].mxu0 }
0x14de   :  { %v1638_v43 = vpop.f32.mrb[42].mxu0 }
0x14df   :  { %v3354_v44 = vpop.f32.mrb[43].mxu0  ;;  %v1692_v45 = vsel %vm3897_vm6, %v1690_v41, -1e+30 }
0x14e0   :  { %v1694_v46 = vsel %vm252_vm5, %v1692_v45, -inf }
0x14e1   :  { %1695 = vmax.xlane.f32.xlu1 %v1694_v46 }
0x14e4   :  { %v1684_v48 = vpop.f32.mrb[44].mxu0 }
0x14e5   :  { %v1691_v49 = vmul.f32 0.35355338, %v1684_v48  ;;  %v3359_v50 = vpop.f32.mrb[45].mxu0 }
0x14e6   :  { %v1687_v53 = vpop.f32.mrb[46].mxu0 }
0x14e7   :  { %v3360_v54 = vpop.f32.mrb[47].mxu0  ;;  %v1693_v56 = vsel %vm3897_vm6, %v1691_v49, -1e+30 }
0x14e8   :  { %v1697_v57 = vsel %vm252_vm5, %v1693_v56, -inf }
0x14e9   :  { %1698 = vmax.xlane.f32.xlu0 %v1697_v57 }
0x14f2   :  { %1718 = vrot.lane.b32.xlu1 %v4183_v31, %s3681_s29 }
0x156e   :  { %v1696_v58 = vpop.xlane.xlu1 %1695 }
0x156f   :  { %v1700_v60 = vsub.f32 %v1692_v45, %v1696_v58 }
0x1571   :  { %v1702_v55 = vmul.f32 1.442695, %v1700_v60 }
0x1572   :  { %v1719_v61 = vpop.permute.xlu1 %1718 }
0x1573   :  { %3613 = vpow2.f32 %v1702_v55  ;;  %v1724_v62 = vsel %vm383_vm7, %v1719_v61, 0 }
0x1574   :  { %3362 = vmatpush3.bf16.msra.mxu0 %v1724_v62 }
0x1575   :  { %3373 = vmatprep.subr.bf16.mxu0 %v3678_v3 }
0x1576   :  { %v1699_v2 = vpop.xlane.xlu0 %1698 }
0x1577   :  { %v1701_v5 = vsub.f32 %v1693_v56, %v1699_v2 }
0x1579   :  { %v1704_v7 = vmul.f32 1.442695, %v1701_v5 }
0x157b   :  { %3615 = vpow2.f32 %v1704_v7 }
0x157d   :  { %v3614_v8 = vpop.eup %3613 }
0x157e   :  { %v1706_v1 = vsel %vm252_vm5, %v3614_v8, 0.0 }
0x157f   :  { %1707 = vadd.xlane.f32.xlu1 %v1706_v1 }
0x1585   :  { %v3616_v9 = vpop.eup %3615 }
0x1586   :  { %v1709_v11 = vsel %vm252_vm5, %v3616_v9, 0.0 }
0x1587   :  { %1710 = vadd.xlane.f32.xlu0 %v1709_v11 }
0x1590   :  { %1816 = vrot.lane.b32.xlu1 %v4183_v31, %s3682_s19 }
0x1594   :  { %1866 = vrot.lane.b32.xlu1 %v4185_v34, %s3682_s19  ;;  %s4534_s19 = smov 16  }
0x1598   :  { %1864 = vrot.lane.b32.xlu1 %v4185_v34, %s3683_s13 }
0x159d   :  { %1766 = vrot.lane.b32.xlu0 %v4185_v34, %s3681_s29  ;;  %s4533_s29 = smov 8  }
0x15a1   :  { %1814 = vrot.lane.b32.xlu0 %v4183_v31, %s3683_s13 }
0x160c   :  { %v1708_v26 = vpop.xlane.xlu1 %1707 }
0x160d   :  { %3617 = vrcp.f32 %v1708_v26 }
0x1610   :  { %v1817_v29 = vpop.permute.xlu1 %1816 }
0x1611   :  { %v1822_v19 = vsel %vm252_vm5, %v1817_v29, 0 }
0x1614   :  { %v1711_v6 = vpop.xlane.xlu0 %1710  ;;  %v1867_v22 = vpop.permute.xlu1 %1866 }
0x1615   :  { %3619 = vrcp.f32 %v1711_v6  ;;  %v1872_v17 = vsel %vm252_vm5, %v1867_v22, 0 }
0x1617   :  { %v3618_v12 = vpop.eup %3617 }
0x1618   :  { %v1714_v13 = vmul.f32 %v3618_v12, %v3614_v8  ;;  %v1767_v14 = vpop.permute.xlu0 %1766  ;;  %v1865_v63 = vpop.permute.xlu1 %1864 }
0x1619   :  { %v1772_v15 = vsel %vm383_vm7, %v1767_v14, 0 }
0x161a   :  { %3368 = vmatpush3.bf16.msra.mxu1 %v1772_v15  ;;  %v1716_v18 = vpack.c.bf16 %v1714_v13, %v1714_v13 }
0x161b   :  { %3379 = vmatprep.subr.bf16.mxu1 %v3678_v3 }
0x161c   :  { %3364 = vmatmul.mubr.msk.bf16.vlgmr.msra.gmra.mrb[48].mxu0 %vm252_vm5, %v1716_v18  ;;  %v1815_v23 = vpop.permute.xlu0 %1814 }
0x161d   :  { %3374 = vmatpush3.bf16.xpose.msra.mxu0 %v1822_v19  ;;  %3375 = vmatprep.mubr.msk.bf16.mxu0 %vm3679_vm0, %v3678_v3 }
0x161e   :  { %3385 = vmatprep.subr.bf16.mxu0 %v3678_v3 }
0x161f   :  { %v3620_v20 = vpop.eup %3619 }
0x1620   :  { %v1715_v21 = vmul.f32 %v3620_v20, %v3616_v9 }
0x1622   :  { %v1717_v16 = vpack.c.bf16 %v1715_v21, %v1715_v21 }
0x1624   :  { %3370 = vmatmul.mubr.msk.bf16.vlgmr.msra.gmra.mrb[48].mxu1 %vm252_vm5, %v1717_v16  ;;  %3376 = vmatmul.mubr.msk.bf16.vlgmr.msra.gmra.mrb[52].mxu0 %vm252_vm5, %v1815_v23 }
0x1625   :  { %3380 = vmatpush3.bf16.xpose.msra.mxu1 %v1872_v17  ;;  %3381 = vmatprep.mubr.msk.bf16.mxu1 %vm3679_vm0, %v3678_v3 }
0x1626   :  { %3391 = vmatprep.subr.bf16.mxu1 %v3678_v3  ;;  %3387 = vmatprep.mubr.msk.bf16.mxu0 %vm3679_vm0, %v3678_v3 }
0x162c   :  { %3382 = vmatmul.mubr.msk.bf16.vlgmr.msra.gmra.mrb[52].mxu1 %vm252_vm5, %v1865_v63 }
0x162d   :  { %3393 = vmatprep.mubr.msk.bf16.mxu1 %vm3679_vm0, %v3678_v3 }
0x16ef   :  { %v4243_v4 = vpop.f32.mrb[48].mxu0 }
0x16f0   :  { %v3365_v24 = vpop.f32.mrb[49].mxu0 }
0x16f1   :  { %v1763_v47 = vpop.f32.mrb[50].mxu0 }
0x16f2   :  { %v3366_v51 = vpop.f32.mrb[51].mxu0 }
0x16f7   :  { %v4245_v52 = vpop.f32.mrb[48].mxu1  ;;  %v1858_v25 = vpop.f32.mrb[52].mxu0 }
0x16f8   :  { %v1914_v27 = vmul.f32 0.35355338, %v1858_v25  ;;  %v3371_v28 = vpop.f32.mrb[49].mxu1  ;;  %v3377_v30 = vpop.f32.mrb[53].mxu0 }
0x16f9   :  { %v1811_v32 = vpop.f32.mrb[50].mxu1  ;;  %v1861_v33 = vpop.f32.mrb[54].mxu0 }
0x16fa   :  { %v3372_v35 = vpop.f32.mrb[51].mxu1  ;;  %v3378_v36 = vpop.f32.mrb[55].mxu0  ;;  %v1916_v37 = vsel %vm3897_vm6, %v1914_v27, -1e+30 }
0x16fb   :  { %v1918_v38 = vsel %vm252_vm5, %v1916_v37, -inf }
0x16fc   :  { %1919 = vmax.xlane.f32.xlu0 %v1918_v38 }
0x16ff   :  { %v1908_v39 = vpop.f32.mrb[52].mxu1 }
0x1700   :  { %v1915_v40 = vmul.f32 0.35355338, %v1908_v39  ;;  %v3383_v41 = vpop.f32.mrb[53].mxu1 }
0x1701   :  { %v1911_v42 = vpop.f32.mrb[54].mxu1 }
0x1702   :  { %v3384_v43 = vpop.f32.mrb[55].mxu1  ;;  %v1917_v44 = vsel %vm3897_vm6, %v1915_v40, -1e+30 }
0x1703   :  { %v1921_v45 = vsel %vm252_vm5, %v1917_v44, -inf }
0x1704   :  { %1922 = vmax.xlane.f32.xlu1 %v1921_v45 }
0x1715   :  { %1942 = vrot.lane.b32.xlu1 %v4183_v31, %s3684_s1 }
0x1719   :  { %2040 = vrot.lane.b32.xlu1 %v4183_v31, %s3685_s20 }
0x171d   :  { %2090 = vrot.lane.b32.xlu1 %v4185_v34, %s3685_s20 }
0x1721   :  { %2088 = vrot.lane.b32.xlu1 %v4185_v34, %s3686_s21 }
0x1789   :  { %v1920_v46 = vpop.xlane.xlu0 %1919 }
0x178a   :  { %v1924_v48 = vsub.f32 %v1916_v37, %v1920_v46 }
0x178c   :  { %v1926_v49 = vmul.f32 1.442695, %v1924_v48 }
0x178e   :  { %3621 = vpow2.f32 %v1926_v49 }
0x1791   :  { %v1923_v50 = vpop.xlane.xlu1 %1922 }
0x1792   :  { %v1925_v53 = vsub.f32 %v1917_v44, %v1923_v50 }
0x1794   :  { %v1928_v54 = vmul.f32 1.442695, %v1925_v53 }
0x1795   :  { %v1943_v56 = vpop.permute.xlu1 %1942 }
0x1796   :  { %3623 = vpow2.f32 %v1928_v54  ;;  %v1948_v57 = vsel %vm383_vm7, %v1943_v56, 0 }
0x1797   :  { %3386 = vmatpush3.bf16.msra.mxu0 %v1948_v57 }
0x1798   :  { %v3622_v58 = vpop.eup %3621  ;;  %3397 = vmatprep.subr.bf16.mxu0 %v3678_v3 }
0x1799   :  { %v1930_v60 = vsel %vm252_vm5, %v3622_v58, 0.0  ;;  %v2041_v1 = vpop.permute.xlu1 %2040 }
0x179a   :  { %1931 = vadd.xlane.f32.xlu0 %v1930_v60  ;;  %v2046_v26 = vsel %vm252_vm5, %v2041_v1, 0 }
0x179d   :  { %v2091_v13 = vpop.permute.xlu1 %2090 }
0x179e   :  { %v2096_v15 = vsel %vm252_vm5, %v2091_v13, 0 }
0x17a0   :  { %v3624_v55 = vpop.eup %3623 }
0x17a1   :  { %v1933_v61 = vsel %vm252_vm5, %v3624_v55, 0.0  ;;  %v2089_v18 = vpop.permute.xlu1 %2088 }
0x17a2   :  { %1934 = vadd.xlane.f32.xlu0 %v1933_v61 }
0x17b8   :  { %1990 = vrot.lane.b32.xlu0 %v4185_v34, %s3684_s1 }
0x17bc   :  { %2038 = vrot.lane.b32.xlu0 %v4183_v31, %s3686_s21 }
0x1827   :  { %v1932_v62 = vpop.xlane.xlu0 %1931 }
0x1828   :  { %3625 = vrcp.f32 %v1932_v62 }
0x182f   :  { %v1935_v2 = vpop.xlane.xlu0 %1934 }
0x1830   :  { %3627 = vrcp.f32 %v1935_v2 }
0x1832   :  { %v3626_v5 = vpop.eup %3625 }
0x1833   :  { %v1938_v7 = vmul.f32 %v3626_v5, %v3622_v58  ;;  %v1991_v8 = vpop.permute.xlu0 %1990 }
0x1834   :  { %v1996_v9 = vsel %vm383_vm7, %v1991_v8, 0 }
0x1835   :  { %3392 = vmatpush3.bf16.msra.mxu1 %v1996_v9  ;;  %v1940_v11 = vpack.c.bf16 %v1938_v7, %v1938_v7 }
0x1836   :  { %3403 = vmatprep.subr.bf16.mxu1 %v3678_v3 }
0x1837   :  { %3388 = vmatmul.mubr.msk.bf16.vlgmr.msra.gmra.mrb[56].mxu0 %vm252_vm5, %v1940_v11  ;;  %v2039_v29 = vpop.permute.xlu0 %2038 }
0x1838   :  { %3398 = vmatpush3.bf16.xpose.msra.mxu0 %v2046_v26  ;;  %3399 = vmatprep.mubr.msk.bf16.mxu0 %vm3679_vm0, %v3678_v3 }
0x1839   :  { %3409 = vmatprep.subr.bf16.mxu0 %v3678_v3 }
0x183a   :  { %v3628_v6 = vpop.eup %3627 }
0x183b   :  { %v1939_v12 = vmul.f32 %v3628_v6, %v3624_v55 }
0x183d   :  { %v1941_v14 = vpack.c.bf16 %v1939_v12, %v1939_v12 }
0x183f   :  { %3394 = vmatmul.mubr.msk.bf16.vlgmr.msra.gmra.mrb[56].mxu1 %vm252_vm5, %v1941_v14  ;;  %3400 = vmatmul.mubr.msk.bf16.vlgmr.msra.gmra.mrb[60].mxu0 %vm252_vm5, %v2039_v29 }
0x1840   :  { %3404 = vmatpush3.bf16.xpose.msra.mxu1 %v2096_v15  ;;  %3405 = vmatprep.mubr.msk.bf16.mxu1 %vm3679_vm0, %v3678_v3 }
0x1841   :  { %3415 = vmatprep.subr.bf16.mxu1 %v3678_v3  ;;  %3411 = vmatprep.mubr.msk.bf16.mxu0 %vm3679_vm0, %v3678_v3 }
0x1847   :  { %3406 = vmatmul.mubr.msk.bf16.vlgmr.msra.gmra.mrb[60].mxu1 %vm252_vm5, %v2089_v18 }
0x1848   :  { %3417 = vmatprep.mubr.msk.bf16.mxu1 %vm3679_vm0, %v3678_v3 }
0x190a   :  { %v4287_v19 = vpop.f32.mrb[56].mxu0 }
0x190b   :  { %v3389_v20 = vpop.f32.mrb[57].mxu0 }
0x190c   :  { %v1987_v21 = vpop.f32.mrb[58].mxu0 }
0x190d   :  { %v3390_v22 = vpop.f32.mrb[59].mxu0 }
0x1912   :  { %v4289_v16 = vpop.f32.mrb[56].mxu1  ;;  %v2082_v23 = vpop.f32.mrb[60].mxu0 }
0x1913   :  { %v3524_v17 = vpack.i.bf16 %v4289_v16, %v4287_v19  ;;  %v2138_v63 = vmul.f32 0.35355338, %v2082_v23  ;;  %v3395_v24 = vpop.f32.mrb[57].mxu1  ;;  %v3401_v47 = vpop.f32.mrb[61].mxu0 }
0x1914   :  { %v2035_v51 = vpop.f32.mrb[58].mxu1  ;;  %v2085_v25 = vpop.f32.mrb[62].mxu0 }
0x1915   :  { %v3396_v27 = vpop.f32.mrb[59].mxu1  ;;  %v3402_v28 = vpop.f32.mrb[63].mxu0  ;;  %v2140_v30 = vsel %vm3897_vm6, %v2138_v63, -1e+30 }
0x1916   :  { %v2142_v32 = vsel %vm252_vm5, %v2140_v30, -inf }
0x1917   :  { %2143 = vmax.xlane.f32.xlu0 %v2142_v32 }
0x191a   :  { %v2132_v33 = vpop.f32.mrb[60].mxu1 }
0x191b   :  { %v2139_v35 = vmul.f32 0.35355338, %v2132_v33  ;;  %v3407_v36 = vpop.f32.mrb[61].mxu1 }
0x191c   :  { %v2135_v37 = vpop.f32.mrb[62].mxu1 }
0x191d   :  { %v3408_v38 = vpop.f32.mrb[63].mxu1  ;;  %v2141_v39 = vsel %vm3897_vm6, %v2139_v35, -1e+30 }
0x191e   :  { %v2145_v40 = vsel %vm252_vm5, %v2141_v39, -inf }
0x191f   :  { %2146 = vmax.xlane.f32.xlu1 %v2145_v40 }
0x1930   :  { %2166 = vrot.lane.b32.xlu1 %v4183_v31, %s3687_s22 }
0x1934   :  { %2264 = vrot.lane.b32.xlu1 %v4183_v31, %s4530_s3 }
0x1938   :  { %2314 = vrot.lane.b32.xlu1 %v4185_v34, %s4530_s3 }
0x193c   :  { %2312 = vrot.lane.b32.xlu1 %v4185_v34, %s4531_s4 }
0x19a4   :  { %v2144_v41 = vpop.xlane.xlu0 %2143 }
0x19a5   :  { %v2148_v42 = vsub.f32 %v2140_v30, %v2144_v41 }
0x19a7   :  { %v2150_v43 = vmul.f32 1.442695, %v2148_v42 }
0x19a9   :  { %3629 = vpow2.f32 %v2150_v43 }
0x19ac   :  { %v2147_v44 = vpop.xlane.xlu1 %2146 }
0x19ad   :  { %v2149_v45 = vsub.f32 %v2141_v39, %v2147_v44 }
0x19af   :  { %v2152_v46 = vmul.f32 1.442695, %v2149_v45 }
0x19b0   :  { %v2167_v48 = vpop.permute.xlu1 %2166 }
0x19b1   :  { %3631 = vpow2.f32 %v2152_v46  ;;  %v2172_v49 = vsel %vm383_vm7, %v2167_v48, 0 }
0x19b2   :  { %3410 = vmatpush3.bf16.msra.mxu0 %v2172_v49 }
0x19b3   :  { %v3630_v50 = vpop.eup %3629  ;;  %3421 = vmatprep.subr.bf16.mxu0 %v3678_v3 }
0x19b4   :  { %v2154_v53 = vsel %vm252_vm5, %v3630_v50, 0.0  ;;  %v2265_v62 = vpop.permute.xlu1 %2264 }
0x19b5   :  { %2155 = vadd.xlane.f32.xlu0 %v2154_v53  ;;  %v2270_v7 = vsel %vm252_vm5, %v2265_v62, 0 }
0x19b8   :  { %v2315_v9 = vpop.permute.xlu1 %2314 }
0x19b9   :  { %v2320_v6 = vsel %vm252_vm5, %v2315_v9, 0 }
0x19bb   :  { %v3632_v54 = vpop.eup %3631 }
0x19bc   :  { %v2157_v56 = vsel %vm252_vm5, %v3632_v54, 0.0  ;;  %v2313_v12 = vpop.permute.xlu1 %2312 }
0x19bd   :  { %2158 = vadd.xlane.f32.xlu0 %v2157_v56 }
0x19d3   :  { %2214 = vrot.lane.b32.xlu0 %v4185_v34, %s3687_s22  ;;  %s4535_s22 = smov 24  }
0x19d7   :  { %2262 = vrot.lane.b32.xlu0 %v4183_v31, %s4531_s4 }
0x1a42   :  { %v2156_v57 = vpop.xlane.xlu0 %2155 }
0x1a43   :  { %3633 = vrcp.f32 %v2156_v57 }
0x1a4a   :  { %v2159_v58 = vpop.xlane.xlu0 %2158 }
0x1a4b   :  { %3635 = vrcp.f32 %v2159_v58 }
0x1a4d   :  { %v3634_v60 = vpop.eup %3633 }
0x1a4e   :  { %v2162_v55 = vmul.f32 %v3634_v60, %v3630_v50  ;;  %v2215_v61 = vpop.permute.xlu0 %2214  ;;  %v3555_v60 = vld [vmem:[%s4493_s6 + $0x10] sm:$0xff]  }
0x1a4f   :  { %v2220_v2 = vsel %vm383_vm7, %v2215_v61, 0 }
0x1a50   :  { %3416 = vmatpush3.bf16.msra.mxu1 %v2220_v2  ;;  %v2164_v5 = vpack.c.bf16 %v2162_v55, %v2162_v55  ;;  %v3556_v55 = vld [vmem:[%s4493_s6 + $0x18] sm:$0xff]  }
0x1a51   :  { %3427 = vmatprep.subr.bf16.mxu1 %v3678_v3 }
0x1a52   :  { %3412 = vmatmul.mubr.msk.bf16.vlgmr.msra.gmra.mrb[64].mxu0 %vm252_vm5, %v2164_v5  ;;  %v2263_v26 = vpop.permute.xlu0 %2262 }
0x1a53   :  { %3422 = vmatpush3.bf16.xpose.msra.mxu0 %v2270_v7  ;;  %3423 = vmatprep.mubr.msk.bf16.mxu0 %vm3679_vm0, %v3678_v3 }
0x1a54   :  { %3433 = vmatprep.subr.bf16.mxu0 %v3678_v3 }
0x1a55   :  { %v3636_v8 = vpop.eup %3635 }
0x1a56   :  { %v2163_v1 = vmul.f32 %v3636_v8, %v3632_v54 }
0x1a58   :  { %v2165_v11 = vpack.c.bf16 %v2163_v1, %v2163_v1 }
0x1a5a   :  { %3418 = vmatmul.mubr.msk.bf16.vlgmr.msra.gmra.mrb[64].mxu1 %vm252_vm5, %v2165_v11  ;;  %3424 = vmatmul.mubr.msk.bf16.vlgmr.msra.gmra.mrb[68].mxu0 %vm252_vm5, %v2263_v26 }
0x1a5b   :  { %3428 = vmatpush3.bf16.xpose.msra.mxu1 %v2320_v6  ;;  %3429 = vmatprep.mubr.msk.bf16.mxu1 %vm3679_vm0, %v3678_v3 }
0x1a5c   :  { %3439 = vmatprep.subr.bf16.mxu1 %v3678_v3  ;;  %3435 = vmatprep.mubr.msk.bf16.mxu0 %vm3679_vm0, %v3678_v3 }
0x1a62   :  { %3430 = vmatmul.mubr.msk.bf16.vlgmr.msra.gmra.mrb[68].mxu1 %vm252_vm5, %v2313_v12 }
0x1a63   :  { %3441 = vmatprep.mubr.msk.bf16.mxu1 %vm3679_vm0, %v3678_v3 }
0x1b25   :  { %v2208_v13 = vpop.f32.mrb[64].mxu0 }
0x1b26   :  { %v3413_v14 = vpop.f32.mrb[65].mxu0 }
0x1b27   :  { %v2211_v29 = vpop.f32.mrb[66].mxu0 }
0x1b28   :  { %v3414_v15 = vpop.f32.mrb[67].mxu0 }
0x1b2d   :  { %v2256_v18 = vpop.f32.mrb[64].mxu1  ;;  %v2306_v20 = vpop.f32.mrb[68].mxu0 }
0x1b2e   :  { %v3529_v21 = vpack.i.bf16 %v2256_v18, %v2208_v13  ;;  %v2362_v22 = vmul.f32 0.35355338, %v2306_v20  ;;  %v3419_v23 = vpop.f32.mrb[65].mxu1  ;;  %v3425_v63 = vpop.f32.mrb[69].mxu0 }
0x1b2f   :  { %v2259_v24 = vpop.f32.mrb[66].mxu1  ;;  %v2309_v47 = vpop.f32.mrb[70].mxu0 }
0x1b30   :  { %v3420_v51 = vpop.f32.mrb[67].mxu1  ;;  %v3426_v25 = vpop.f32.mrb[71].mxu0  ;;  %v2364_v27 = vsel %vm3897_vm6, %v2362_v22, -1e+30 }
0x1b31   :  { %v2366_v28 = vsel %vm252_vm5, %v2364_v27, -inf }
0x1b32   :  { %2367 = vmax.xlane.f32.xlu0 %v2366_v28 }
0x1b35   :  { %v2356_v30 = vpop.f32.mrb[68].mxu1 }
0x1b36   :  { %v2363_v32 = vmul.f32 0.35355338, %v2356_v30  ;;  %v3431_v33 = vpop.f32.mrb[69].mxu1 }
0x1b37   :  { %v2359_v35 = vpop.f32.mrb[70].mxu1 }
0x1b38   :  { %v3432_v36 = vpop.f32.mrb[71].mxu1  ;;  %v2365_v37 = vsel %vm3897_vm6, %v2363_v32, -1e+30 }
0x1b39   :  { %v2369_v38 = vsel %vm252_vm5, %v2365_v37, -inf }
0x1b3a   :  { %2370 = vmax.xlane.f32.xlu1 %v2369_v38 }
0x1b4b   :  { %2390 = vrot.lane.b32.xlu1 %v4183_v31, %s4532_s0 }
0x1b4f   :  { %3525 = vrot.lane.b32.xlu1 %v3524_v17, %s4533_s29 }
0x1b53   :  { %3530 = vrot.lane.b32.xlu1 %v3529_v21, %s4534_s19 }
0x1bbf   :  { %v2368_v39 = vpop.xlane.xlu0 %2367 }
0x1bc0   :  { %v2372_v40 = vsub.f32 %v2364_v27, %v2368_v39 }
0x1bc2   :  { %v2374_v41 = vmul.f32 1.442695, %v2372_v40 }
0x1bc4   :  { %3637 = vpow2.f32 %v2374_v41 }
0x1bc7   :  { %v2371_v42 = vpop.xlane.xlu1 %2370 }
0x1bc8   :  { %v2373_v10 = vsub.f32 %v2365_v37, %v2371_v42 }
0x1bca   :  { %v2376_v43 = vmul.f32 1.442695, %v2373_v10 }
0x1bcb   :  { %v2391_v44 = vpop.permute.xlu1 %2390 }
0x1bcc   :  { %3639 = vpow2.f32 %v2376_v43  ;;  %v2396_v45 = vsel %vm383_vm7, %v2391_v44, 0 }
0x1bcd   :  { %3434 = vmatpush3.bf16.msra.mxu0 %v2396_v45  ;;  %v3557_v45 = vld [vmem:[%s4497_s10 + $0x10] sm:$0xff]  }
0x1bce   :  { %v3638_v31 = vpop.eup %3637  ;;  %3445 = vmatprep.subr.bf16.mxu0 %v3678_v3 }
0x1bcf   :  { %v2378_v19 = vsel %vm252_vm5, %v3638_v31, 0.0  ;;  %v3526_v26 = vpop.permute.xlu1 %3525 }
0x1bd0   :  { %2379 = vadd.xlane.f32.xlu0 %v2378_v19  ;;  %v3528_v12 = vunpack.i.h.bf16 %v3526_v26  ;;  %v3527_v13 = vunpack.i.l.bf16 %v3526_v26  ;;  %v3559_v19 = vld [vmem:[%s4499_s12 + $0x40] sm:$0xff]   ;;  %v3566_v26 = vld [vmem:[%s4499_s12 + $0x78] sm:$0xff]  }
0x1bd2   :  { %v2511_v18 = vsel %vm252_vm5, %v4245_v52, %v3528_v12  ;;  %v2510_v20 = vsel %vm252_vm5, %v4243_v4, %v3527_v13  ;;  %v3035_v4 = vld [vmem:[%s4494_s7 + $0x1] ss:$0 sm:$0xff] }
0x1bd3   :  { %v3531_v6 = vpop.permute.xlu1 %3530 }
0x1bd4   :  { %v3533_v14 = vunpack.i.h.bf16 %v3531_v6  ;;  %v3532_v29 = vunpack.i.l.bf16 %v3531_v6  ;;  %v3045_v6 = vld [vmem:[%s4498_s11 + $0x1] ss:$0 sm:$0xff] }
0x1bd6   :  { %v3640_v16 = vpop.eup %3639  ;;  %v2512_v23 = vsel %vm1173_vm8, %v2510_v20, %v3532_v29  ;;  %v2513_v63 = vsel %vm1173_vm8, %v2511_v18, %v3533_v14 }
0x1bd7   :  { %v2381_v17 = vsel %vm252_vm5, %v3640_v16, 0.0 }
0x1bd8   :  { %2382 = vadd.xlane.f32.xlu0 %v2381_v17  ;;  %v3561_v17 = vld [vmem:[%s4499_s12 + $0x50] sm:$0xff]  }
0x1bee   :  { %2438 = vrot.lane.b32.xlu0 %v4185_v34, %s4532_s0 }
0x1c5d   :  { %v2380_v46 = vpop.xlane.xlu0 %2379 }
0x1c5e   :  { %3641 = vrcp.f32 %v2380_v46  ;;  %v3562_v46 = vld [vmem:[%s4499_s12 + $0x58] sm:$0xff]  }
0x1c65   :  { %v2383_v48 = vpop.xlane.xlu0 %2382 }
0x1c66   :  { %3643 = vrcp.f32 %v2383_v48  ;;  %v3563_v48 = vld [vmem:[%s4499_s12 + $0x60] sm:$0xff]  }
0x1c68   :  { %v3642_v49 = vpop.eup %3641 }
0x1c69   :  { %v2386_v50 = vmul.f32 %v3642_v49, %v3638_v31  ;;  %v2439_v53 = vpop.permute.xlu0 %2438  ;;  %v3558_v31 = vld [vmem:[%s4497_s10 + $0x18] sm:$0xff]   ;;  %v3564_v49 = vld [vmem:[%s4499_s12 + $0x68] sm:$0xff]  }
0x1c6a   :  { %v2444_v54 = vsel %vm383_vm7, %v2439_v53, 0 }
0x1c6b   :  { %3440 = vmatpush3.bf16.msra.mxu1 %v2444_v54  ;;  %v2388_v56 = vpack.c.bf16 %v2386_v50, %v2386_v50 }
0x1c6c   :  { %3453 = vmatprep.subr.bf16.mxu1 %v3678_v3 }
0x1c6d   :  { %3436 = vmatmul.mubr.msk.bf16.vlgmr.msra.gmra.mrb[72].mxu0 %vm252_vm5, %v2388_v56 }
0x1c6e   :  { %3449 = vmatprep.mubr.msk.bf16.mxu0 %vm3679_vm0, %v3678_v3  ;;  %3446 = vmatpush3.bf16.msra.mxu0 %v3555_v60  ;;  %v3038_v60 = vld [vmem:[%s4495_s8 + $0x1] ss:$0 sm:$0xff] }
0x1c6f   :  { %3447 = vmatprep.subr.bf16.mxu0 %v3678_v3 }
0x1c70   :  { %v3644_v57 = vpop.eup %3643 }
0x1c71   :  { %v2387_v34 = vmul.f32 %v3644_v57, %v3640_v16  ;;  %v3560_v16 = vld [vmem:[%s4499_s12 + $0x48] sm:$0xff]  }
0x1c72   :  { %3448 = vmatpush3.bf16.msra.mxu0 %v3556_v55 }
0x1c73   :  { %v2389_v58 = vpack.c.bf16 %v2387_v34, %v2387_v34  ;;  %3461 = vmatprep.subr.bf16.mxu0 %v3678_v3 }
0x1c75   :  { %3442 = vmatmul.mubr.msk.bf16.vlgmr.msra.gmra.mrb[72].mxu1 %vm252_vm5, %v2389_v58 }
0x1c76   :  { %3457 = vmatprep.mubr.msk.bf16.mxu1 %vm3679_vm0, %v3678_v3  ;;  %3454 = vmatpush3.bf16.msra.mxu1 %v3557_v45 }
0x1c77   :  { %3455 = vmatprep.subr.bf16.mxu1 %v3678_v3 }
0x1c7a   :  { %3456 = vmatpush3.bf16.msra.mxu1 %v3558_v31 }
0x1c7b   :  { %3481 = vmatprep.subr.bf16.mxu1 %v3678_v3 }
0x1d40   :  { %v2432_v61 = vpop.f32.mrb[72].mxu0 }
0x1d41   :  { %v3437_v62 = vpop.f32.mrb[73].mxu0 }
0x1d42   :  { %v2435_v2 = vpop.f32.mrb[74].mxu0 }
0x1d43   :  { %v3438_v5 = vpop.f32.mrb[75].mxu0 }
0x1d44   :  { %v3039_v5 = vld [vmem:[%s4496_s9 + $0x1] ss:$0 sm:$0xff] }
0x1d48   :  { %v2480_v7 = vpop.f32.mrb[72].mxu1 }
0x1d49   :  { %v3534_v8 = vpack.i.bf16 %v2480_v7, %v2432_v61  ;;  %v3443_v1 = vpop.f32.mrb[73].mxu1 }
0x1d4a   :  { %v2483_v9 = vpop.f32.mrb[74].mxu1 }
0x1d4b   :  { %3535 = vrot.lane.b32.xlu0 %v3534_v8, %s4535_s22  ;;  %v3444_v11 = vpop.f32.mrb[75].mxu1 }
0x1d4c   :  { %v3565_v11 = vld [vmem:[%s4499_s12 + $0x70] sm:$0xff]  }
0x1dbd   :  { %v3536_v15 = vpop.permute.xlu0 %3535 }
0x1dbe   :  { %v3538_v21 = vunpack.i.h.bf16 %v3536_v15  ;;  %v3537_v22 = vunpack.i.l.bf16 %v3536_v15 }
0x1dc0   :  { %v2515_v24 = vsel %vm1176_vm9, %v2513_v63, %v3538_v21  ;;  %v2514_v47 = vsel %vm1176_vm9, %v2512_v23, %v3537_v22  ;;  %v3074_v63 = vld [vmem:[%s4529_s24 + $0x1] ss:$0 sm:$0xff] }
0x1dc1   :  { %v2516_v51 = vpack.c.bf16 %v2515_v24, %v2514_v47 }
0x1dc3   :  { %3450 = vmatmul.mubr.msk.bf16.vlgmr.msra.gmra.mrb[76].mxu0 %vm142_vm4, %v2516_v51 }
0x1dc4   :  { %3477 = vmatprep.mubr.msk.bf16.mxu0 %vm3679_vm0, %v3678_v3  ;;  %3462 = vmatpush3.bf16.msra.mxu0 %v3559_v19 }
0x1dc5   :  { %3463 = vmatprep.subr.bf16.mxu0 %v3678_v3 }
0x1dc8   :  { %3464 = vmatpush3.bf16.msra.mxu0 %v3560_v16 }
0x1dc9   :  { %3465 = vmatprep.subr.bf16.mxu0 %v3678_v3 }
0x1dcc   :  { %3466 = vmatpush3.bf16.msra.mxu0 %v3561_v17  ;;  %v3075_v17 = vld [vmem:[%s4501_s14] ss:$0 sm:$0xff]  ;;  %s3694_s14 = smov [#allocation2]  }
0x1dcd   :  { %3467 = vmatprep.subr.bf16.mxu0 %v3678_v3  ;;  %s2946_s19 = sshll.u32 %s3694_s14, 4  ;;  %s2947_s19 = int_to_ptr.vmem [resolvable:$true] %s2946_s19 }
0x1dce   :  { %p3658_p1 = scmp.lt.s32.totalorder %s2947_s19, %s2947_s19 }
0x1dd0   :  { %3468 = vmatpush3.bf16.msra.mxu0 %v3562_v46 }
0x1dd1   :  { %3469 = vmatprep.subr.bf16.mxu0 %v3678_v3 }
0x1dd4   :  { %3470 = vmatpush3.bf16.msra.mxu0 %v3563_v48 }
0x1dd5   :  { %3471 = vmatprep.subr.bf16.mxu0 %v3678_v3 }
0x1dd8   :  { %3472 = vmatpush3.bf16.msra.mxu0 %v3564_v49 }
0x1dd9   :  { %3473 = vmatprep.subr.bf16.mxu0 %v3678_v3 }
0x1ddc   :  { %3474 = vmatpush3.bf16.msra.mxu0 %v3565_v11 }
0x1ddd   :  { %3475 = vmatprep.subr.bf16.mxu0 %v3678_v3 }
0x1de0   :  { %3476 = vmatpush3.bf16.msra.mxu0 %v3566_v26 }
0x1e96   :  { %v2571_v52 = vpop.f32.mrb[76].mxu0 }
0x1e97   :  { %v2578_v25 = vadd.f32 %v2571_v52, %v4153_v59  ;;  %v3451_v27 = vpop.f32.mrb[77].mxu0 }
0x1e98   :  { %v2574_v28 = vpop.f32.mrb[78].mxu0 }
0x1e99   :  { %v4384_v30 = vadd.f32 %v3035_v4, %v2578_v25  ;;  %v2579_v32 = vadd.f32 %v2574_v28, %v4156_v0  ;;  %v3452_v33 = vpop.f32.mrb[79].mxu0 }
0x1e9b   :  { %v4387_v35 = vadd.f32 %v3035_v4, %v2579_v32  ;;  %v2594_v36 = vsel %vm142_vm4, %v4384_v30, 0.0 }
0x1e9c   :  { %2595 = vadd.xlane.f32.xlu1 %v2594_v36 }
0x1e9d   :  { %v2597_v37 = vsel %vm142_vm4, %v4387_v35, 0.0 }
0x1e9e   :  { %2598 = vadd.xlane.f32.xlu0 %v2597_v37 }
0x1f29   :  { %v2596_v38 = vpop.xlane.xlu1 %2595 }
0x1f2a   :  { %v2600_v39 = vmul.f32 0.03125, %v2596_v38 }
0x1f2b   :  { %v2599_v59 = vpop.xlane.xlu0 %2598 }
0x1f2c   :  { %v2602_v40 = vsub.f32 %v4384_v30, %v2600_v39  ;;  %v2601_v41 = vmul.f32 0.03125, %v2599_v59 }
0x1f2e   :  { %v2603_v42 = vsub.f32 %v4387_v35, %v2601_v41  ;;  %v2604_v0 = vmul.f32 %v2602_v40, %v2602_v40 }
0x1f30   :  { %v2606_v10 = vsel %vm142_vm4, %v2604_v0, 0.0  ;;  %v2605_v43 = vmul.f32 %v2603_v42, %v2603_v42  ;;  %v3568_v0 = vld [vmem:[%s4503_s16 + $0x8] sm:$0xff]  }
0x1f31   :  { %2607 = vadd.xlane.f32.xlu0 %v2606_v10 }
0x1f32   :  { %v2609_v44 = vsel %vm142_vm4, %v2605_v43, 0.0 }
0x1f33   :  { %2610 = vadd.xlane.f32.xlu1 %v2609_v44 }
0x1fbe   :  { %v2608_v50 = vpop.xlane.xlu0 %2607 }
0x1fbf   :  { %v2612_v53 = vmul.f32 0.03125, %v2608_v50 }
0x1fc0   :  { %v2611_v54 = vpop.xlane.xlu1 %2610 }
0x1fc1   :  { %v2614_v56 = vadd.f32 1e-05, %v2612_v53  ;;  %v2613_v57 = vmul.f32 0.03125, %v2611_v54 }
0x1fc3   :  { %3645 = vrsqrt.f32 %v2614_v56  ;;  %v2615_v34 = vadd.f32 1e-05, %v2613_v57 }
0x1fc5   :  { %3647 = vrsqrt.f32 %v2615_v34  ;;  %v3077_v34 = vld [vmem:[%s4504_s17] ss:$0 sm:$0xff] }
0x1fcd   :  { %v3646_v58 = vpop.eup %3645 }
0x1fce   :  { %v2618_v55 = vmul.f32 %v3646_v58, %v2602_v40 }
0x1fcf   :  { %v3648_v61 = vpop.eup %3647 }
0x1fd0   :  { %v2626_v62 = vmul.f32 %v3038_v60, %v2618_v55  ;;  %v2619_v2 = vmul.f32 %v3648_v61, %v2603_v42  ;;  %v3567_v42 = vld [vmem:[%s4503_s16] sm:$0xff]  }
0x1fd2   :  { %v2627_v7 = vmul.f32 %v3038_v60, %v2619_v2  ;;  %v2634_v8 = vadd.f32 %v3039_v5, %v2626_v62 }
0x1fd4   :  { %v2635_v1 = vadd.f32 %v3039_v5, %v2627_v7 }
0x1fd6   :  { %v2636_v9 = vpack.c.bf16 %v2635_v1, %v2634_v8 }
0x1fd8   :  { %3458 = vmatmul.mubr.msk.bf16.vlgmr.msra.gmra.mrb[76].mxu1 %vm142_vm4, %v2636_v9 }
0x1fd9   :  { %3485 = vmatprep.mubr.msk.bf16.mxu1 %vm3679_vm0, %v3678_v3  ;;  %3482 = vmatpush3.bf16.msra.mxu1 %v3567_v42 }
0x1fda   :  { %3483 = vmatprep.subr.bf16.mxu1 %v3678_v3  ;;  %v3076_v3 = vld [vmem:[%s4502_s15] ss:$0 sm:$0xff]  ;;  %s3653_s15 = scalar_lea.vmem %s2947_s19, 256 }
0x1fdb   :  { %p3654_p0 = scmp.ne.s32.totalorder %s2947_s19, %s3653_s15  ;;  %p3659_p2 = scmp.lt.s32.totalorder %s3653_s15, %s3653_s15 }
0x1fdd   :  { %3484 = vmatpush3.bf16.msra.mxu1 %v3568_v0  ;;  %p3660_p3 = por %p3659_p2, %p3658_p1 }
0x1fdf   :  { %p3661_p4 = pnand %p3660_p3, %p3654_p0 }
0x20ab   :  { %v2699_v12 = vpop.f32.mrb[76].mxu1 }
0x20ac   :  { %v2700_v13 = vadd.f32 %v3045_v6, %v2699_v12  ;;  %v3459_v14 = vpop.f32.mrb[77].mxu1 }
0x20ad   :  { %v2702_v29 = vpop.f32.mrb[78].mxu1 }
0x20ae   :  { %v2703_v15 = vadd.f32 %v3045_v6, %v2702_v29  ;;  %v3460_v18 = vpop.f32.mrb[79].mxu1  ;;  %v2706_v20 = vmax.f32 %v2700_v13, 0.0 }
0x20b0   :  { %v2707_v21 = vmax.f32 %v2703_v15, 0.0 }
0x20b2   :  { %v2708_v22 = vpack.c.bf16 %v2707_v21, %v2706_v20 }
0x20b4   :  { %3478 = vmatmul.mubr.bf16.vlgmr.msra.gmra.mrb[80].mxu0 %v2708_v22 }
0x2187   :  { %v2808_v23 = vpop.f32.mrb[80].mxu0 }
0x2188   :  { %v2815_v24 = vadd.f32 %v2808_v23, %v4384_v30  ;;  %v3479_v47 = vpop.f32.mrb[81].mxu0 }
0x2189   :  { %v2811_v51 = vpop.f32.mrb[82].mxu0 }
0x218a   :  { %v2825_v52 = vadd.f32 %v3074_v63, %v2815_v24  ;;  %v2816_v4 = vadd.f32 %v2811_v51, %v4387_v35  ;;  %v3480_v25 = vpop.f32.mrb[83].mxu0 }
0x218c   :  { %v2829_v27 = vsel %vm142_vm4, %v2825_v52, 0.0  ;;  %v2826_v28 = vadd.f32 %v3074_v63, %v2816_v4 }
0x218d   :  { %2830 = vadd.xlane.f32.xlu0 %v2829_v27 }
0x218e   :  { %v2832_v32 = vsel %vm142_vm4, %v2826_v28, 0.0 }
0x218f   :  { %2833 = vadd.xlane.f32.xlu1 %v2832_v32 }
0x221a   :  { %v2831_v33 = vpop.xlane.xlu0 %2830 }
0x221b   :  { %v2835_v36 = vmul.f32 0.03125, %v2831_v33 }
0x221c   :  { %v2834_v37 = vpop.xlane.xlu1 %2833 }
0x221d   :  { %v2837_v38 = vsub.f32 %v2825_v52, %v2835_v36  ;;  %v2836_v39 = vmul.f32 0.03125, %v2834_v37 }
0x221f   :  { %v2838_v59 = vsub.f32 %v2826_v28, %v2836_v39  ;;  %v2839_v30 = vmul.f32 %v2837_v38, %v2837_v38 }
0x2221   :  { %v2841_v40 = vsel %vm142_vm4, %v2839_v30, 0.0  ;;  %v2840_v41 = vmul.f32 %v2838_v59, %v2838_v59 }
0x2222   :  { %2842 = vadd.xlane.f32.xlu0 %v2841_v40 }
0x2223   :  { %v2844_v35 = vsel %vm142_vm4, %v2840_v41, 0.0 }
0x2224   :  { %2845 = vadd.xlane.f32.xlu1 %v2844_v35 }
0x22af   :  { %v2843_v10 = vpop.xlane.xlu0 %2842 }
0x22b0   :  { %v2847_v43 = vmul.f32 0.03125, %v2843_v10 }
0x22b1   :  { %v2846_v44 = vpop.xlane.xlu1 %2845 }
0x22b2   :  { %v2849_v45 = vadd.f32 1e-05, %v2847_v43  ;;  %v2848_v31 = vmul.f32 0.03125, %v2846_v44 }
0x22b4   :  { %3649 = vrsqrt.f32 %v2849_v45  ;;  %v2850_v19 = vadd.f32 1e-05, %v2848_v31 }
0x22b6   :  { %3651 = vrsqrt.f32 %v2850_v19 }
0x22be   :  { %v3650_v16 = vpop.eup %3649 }
0x22bf   :  { %v2853_v46 = vmul.f32 %v3650_v16, %v2837_v38 }
0x22c0   :  { %v3652_v48 = vpop.eup %3651 }
0x22c1   :  { %v2861_v49 = vmul.f32 %v3075_v17, %v2853_v46  ;;  %v2854_v50 = vmul.f32 %v3652_v48, %v2838_v59 }
0x22c3   :  { %v2862_v53 = vmul.f32 %v3075_v17, %v2854_v50  ;;  %v2869_v54 = vadd.f32 %v3076_v3, %v2861_v49 }
0x22c5   :  { %v2870_v56 = vadd.f32 %v3076_v3, %v2862_v53 }
0x22c7   :  { %v2871_v57 = vpack.c.bf16 %v2870_v56, %v2869_v54 }
0x22c9   :  { %3486 = vmatmul.mubr.msk.bf16.vlgmr.msra.gmra.mrb[80].mxu1 %vm142_vm4, %v2871_v57 }
0x239c   :  { %v2932_v58 = vpop.f32.mrb[80].mxu1 }
0x239d   :  { %v2933_v60 = vadd.f32 %v3077_v34, %v2932_v58  ;;  %v3487_v55 = vpop.f32.mrb[81].mxu1 }
0x239e   :  { %v2935_v61 = vpop.f32.mrb[82].mxu1 }
0x239f   :  { %2939 = vst [vmem:[#allocation2] sm:$0xff] %v2933_v60  ;;  %v2936_v62 = vadd.f32 %v3077_v34, %v2935_v61  ;;  %v3488_v2 = vpop.f32.mrb[83].mxu1 }
0x23a1   :  { %2940 = vst [vmem:[#allocation2 + $0x8] sm:$0xff] %v2936_v62 }
0x23a2   :  { %3664 = shalt.err (!%p3661_p4)
}
0x23a3   :  { %s3665_s1 = scalar_lea.hbm %s4505_s18, 256 }
0x23a4   :  { %p3666_p5 = scmp.ne.s32.totalorder %s4505_s18, %s3665_s1  ;;  %p3669_p6 = scmp.lt.u32.totalorder %s3665_s1, %s4505_s18 }
0x23a6   :  { %p3671_p7 = pnand %p3669_p6, %p3666_p5 }
0x23a8   :  { %3674 = shalt.err (!%p3671_p7)
}
0x23a9   :  { %s3695_s2 = smov 128  }
0x23aa   :  { %2952 = dma.vmem_to_hbm [thread:$0]  %s2947_s19, 256, %s4505_s18, [#allocation3], %s3695_s2, %s3695_s2, %s4533_s29  }
0x23ab   :  { %3675 = dma.done.wait [#allocation3], 256  }
0x23ac   :  { %3676 = vsyncadd [#allocation3], 4294967040 }
0x23ad   :  { %2956 = vsyncpa [#allocation3], 1 }

</bundles_post_ra>
